<compile_context>
chip_gen: v7x
topology: tpu7x:2x2x1
jax: 0.10.0
libtpu: 0.0.40
codegen_flags: <defaults>
</compile_context>

<pallas_src>
import functools

import jax
import jax.numpy as jnp
from jax.experimental import pallas as pl
from jax.experimental.pallas import tpu as pltpu


def _round_up(a, m):
    return ((a + m - 1) // m) * m


def _mlp_kernel(n_hidden, x_ref, w_in_ref, b_in_ref, *rest):
    # rest = [w_h, scale_h, shift_h] * n_hidden + [w_out, b_out, o_ref]
    w_out_ref = rest[3 * n_hidden]
    b_out_ref = rest[3 * n_hidden + 1]
    o_ref = rest[3 * n_hidden + 2]

    # Input Linear: bf16 x bf16 on the MXU, f32 accumulate.
    h = jnp.dot(x_ref[...], w_in_ref[...], preferred_element_type=jnp.float32)
    h = h + b_in_ref[...]
    # TODO(synk): nn.Dropout(p=0.2) is identity in eval/inference mode; training-mode
    # stochastic dropout (and batch-statistic BatchNorm) are not implemented.

    for k in range(n_hidden):             # static unroll over hidden blocks
        w_ref = rest[3 * k]
        s_ref = rest[3 * k + 1]
        t_ref = rest[3 * k + 2]
        h = jnp.dot(h.astype(jnp.bfloat16), w_ref[...],
                    preferred_element_type=jnp.float32)
        h = h * s_ref[...] + t_ref[...]    # Linear bias + BatchNorm(eval) folded (f32 VPU)
        h = jnp.maximum(h, 0.0)            # ReLU (f32 VPU)

    out = jnp.dot(h.astype(jnp.bfloat16), w_out_ref[...],
                  preferred_element_type=jnp.float32)
    o_ref[...] = (out + b_out_ref[...]).astype(o_ref.dtype)


def _build_call(n_hidden, tb, d_pad, wd, o_pad, b_pad, cost, single_buffer_weights):
    if single_buffer_weights:
        # Grid-invariant operands (block index never changes): one VMEM copy is enough.
        def const(shape):
            return pl.BlockSpec(shape, lambda i: (0, 0), pipeline_mode=pl.Buffered(1))
    else:
        def const(shape):
            return pl.BlockSpec(shape, lambda i: (0, 0))

    in_specs = [pl.BlockSpec((tb, d_pad), lambda i: (i, 0)),   # x: gridded over batch
                const((d_pad, wd)), const((1, wd))]
    for _ in range(n_hidden):
        in_specs += [const((wd, wd)), const((1, wd)), const((1, wd))]
    in_specs += [const((wd, o_pad)), const((1, o_pad))]

    return pl.pallas_call(
        functools.partial(_mlp_kernel, n_hidden),
        out_shape=jax.ShapeDtypeStruct((b_pad, o_pad), jnp.float32),
        grid=(b_pad // tb,),
        in_specs=in_specs,
        out_specs=pl.BlockSpec((tb, o_pad), lambda i: (i, 0)),
        compiler_params=pltpu.CompilerParams(
            dimension_semantics=("parallel",),      # v7x: 2 TCs split batch blocks
            vmem_limit_bytes=32 * 1024 * 1024),     # above v5e's 16 MiB scoped default
        cost_estimate=cost,
    )


def mlp_forward(x, params, *, block_batch=512, eps=1e-5):
    """Eval-mode MLP forward. x: (B, n_inputs) f32 -> (B, n_outputs) f32."""
    B, D = x.shape
    Wd = params["w_in"].shape[1]
    O = params["w_out"].shape[1]
    n_hidden = len(params["hiddens"])

    # Fold Linear bias + eval-mode BatchNorm into per-feature scale/shift (kept f32);
    # cast matmul weights to bf16 once (MXU operands; f32 accumulation in-kernel).
    hidden_args = []
    for (w, b, gamma, beta, mean, var) in params["hiddens"]:
        scale = (gamma * jax.lax.rsqrt(var + eps)).astype(jnp.float32)
        shift = ((b - mean) * scale + beta).astype(jnp.float32)
        hidden_args += [w.astype(jnp.bfloat16),
                        scale.reshape(1, Wd), shift.reshape(1, Wd)]

    # First-layer K alignment: zero-pad the contraction dim (192 -> 256 here).
    D_pad = _round_up(D, 128)
    w_in = params["w_in"]
    if D_pad != D:
        w_in = jnp.pad(w_in, ((0, D_pad - D), (0, 0)))
        x = jnp.pad(x, ((0, 0), (0, D_pad - D)))
    w_in = w_in.astype(jnp.bfloat16)

    # Lane-dense output slab: pad output features to a multiple of 128 (unmasked vst).
    O_pad = _round_up(O, 128)
    w_out, b_out = params["w_out"], params["b_out"]
    if O_pad != O:
        w_out = jnp.pad(w_out, ((0, 0), (0, O_pad - O)))
        b_out = jnp.pad(b_out, (0, O_pad - O))
    w_out = w_out.astype(jnp.bfloat16)
    b_out = b_out.reshape(1, O_pad).astype(jnp.float32)
    b_in = params["b_in"].reshape(1, Wd).astype(jnp.float32)

    # Batch tiling: large tile (amortizes per-grid-step overhead, fills the MXU M dim),
    # sublane aligned, and >=2 blocks when the batch allows so both v7x TCs get work.
    tb = min(block_batch, _round_up(B, 8))
    if _round_up(B, tb) // tb < 2 and _round_up(B, 8) >= 16:
        tb = _round_up(pl.cdiv(B, 2), 8)
    B_pad = _round_up(B, tb)
    if B_pad != B:
        x = jnp.pad(x, ((0, B_pad - B), (0, 0)))
    x = x.astype(jnp.bfloat16)      # halves x DMA bytes; matmul still accumulates in f32

    flops = 2 * B_pad * (D_pad * Wd + n_hidden * Wd * Wd + Wd * O_pad)
    param_bytes = (w_in.size * 2 + b_in.size * 4
                   + n_hidden * (Wd * Wd * 2 + 2 * Wd * 4)
                   + w_out.size * 2 + b_out.size * 4)
    cost = pl.CostEstimate(flops=flops, transcendentals=0,
                           bytes_accessed=x.size * 2 + param_bytes + B_pad * O_pad * 4)

    args = (x, w_in, b_in, *hidden_args, w_out, b_out)
    try:
        out = _build_call(n_hidden, tb, D_pad, Wd, O_pad, B_pad, cost, True)(*args)
    except Exception:
        # jax version without per-BlockSpec pipeline_mode: fall back to default
        # (double-buffered) weight specs. Same semantics, ~1 MiB extra VMEM.
        out = _build_call(n_hidden, tb, D_pad, Wd, O_pad, B_pad, cost, False)(*args)
    return out[:B, :O]


if __name__ == "__main__":
    n_inputs, mlp_width, n_outputs, mlp_depth = 192, 256, 1, 5
    n_hidden = mlp_depth - 2
    batch = 8
    eps = 1e-5

    keys = iter(jax.random.split(jax.random.PRNGKey(0), 32))

    def init_linear(key, fan_in, fan_out):
        k1, k2 = jax.random.split(key)
        bound = 1.0 / (fan_in ** 0.5)
        w = jax.random.uniform(k1, (fan_in, fan_out), jnp.float32, -bound, bound)
        b = jax.random.uniform(k2, (fan_out,), jnp.float32, -bound, bound)
        return w, b

    x = jax.random.normal(next(keys), (batch, n_inputs), dtype=jnp.float32)

    w_in, b_in = init_linear(next(keys), n_inputs, mlp_width)
    hiddens = []
    for _ in range(n_hidden):
        w, b = init_linear(next(keys), mlp_width, mlp_width)
        gamma = jax.random.uniform(next(keys), (mlp_width,), jnp.float32, 0.5, 1.5)
        beta = 0.1 * jax.random.normal(next(keys), (mlp_width,), dtype=jnp.float32)
        mean = 0.1 * jax.random.normal(next(keys), (mlp_width,), dtype=jnp.float32)
        var = jax.random.uniform(next(keys), (mlp_width,), jnp.float32, 0.5, 1.5)
        hiddens.append((w, b, gamma, beta, mean, var))
    w_out, b_out = init_linear(next(keys), mlp_width, n_outputs)

    params = {"w_in": w_in, "b_in": b_in, "hiddens": hiddens,
              "w_out": w_out, "b_out": b_out}

    out = mlp_forward(x, params)
    out = jax.block_until_ready(out)

    # Plain-JAX f32 reference (eval-mode forward, unfolded BatchNorm).
    def ref_forward(xr):
        h = xr @ w_in + b_in
        for (w, b, gamma, beta, mean, var) in hiddens:
            y = h @ w + b
            y = (y - mean) / jnp.sqrt(var + eps) * gamma + beta
            h = jnp.maximum(y, 0.0)
        return h @ w_out + b_out

    ref = ref_forward(x)
    assert out.shape == (batch, n_outputs)
    assert jnp.allclose(out, ref, atol=2e-2, rtol=2e-2), \
        f"max abs diff {jnp.max(jnp.abs(out - ref))}"

    print("KERNEL_OK")
</pallas_src>

<mosaic_0001>
module attributes {stable_mosaic.version = 11 : i64} {
  func.func @_mlp_kernel(%arg0: i32, %arg1: memref<8x256xbf16, #tpu.memory_space<vmem>>, %arg2: memref<256x256xbf16, #tpu.memory_space<vmem>>, %arg3: memref<1x256xf32, #tpu.memory_space<vmem>>, %arg4: memref<256x256xbf16, #tpu.memory_space<vmem>>, %arg5: memref<1x256xf32, #tpu.memory_space<vmem>>, %arg6: memref<1x256xf32, #tpu.memory_space<vmem>>, %arg7: memref<256x256xbf16, #tpu.memory_space<vmem>>, %arg8: memref<1x256xf32, #tpu.memory_space<vmem>>, %arg9: memref<1x256xf32, #tpu.memory_space<vmem>>, %arg10: memref<256x256xbf16, #tpu.memory_space<vmem>>, %arg11: memref<1x256xf32, #tpu.memory_space<vmem>>, %arg12: memref<1x256xf32, #tpu.memory_space<vmem>>, %arg13: memref<256x128xbf16, #tpu.memory_space<vmem>>, %arg14: memref<1x128xf32, #tpu.memory_space<vmem>>, %arg15: memref<8x128xf32, #tpu.memory_space<vmem>>) attributes {dimension_semantics = [#tpu.dimension_semantics<parallel>], iteration_bounds = array<i64: 1>, scalar_prefetch = 0 : i64, scratch_operands = 0 : i64, tpu.core_type = #tpu.core_type<tc>, window_params = [{transform_indices = @transform_0, window_bounds = array<i64: 8, 256>}, {pipeline_mode = #tpu.pipeline_mode<synchronous>, transform_indices = @transform_1, window_bounds = array<i64: 256, 256>}, {pipeline_mode = #tpu.pipeline_mode<synchronous>, transform_indices = @transform_2, window_bounds = array<i64: 1, 256>}, {pipeline_mode = #tpu.pipeline_mode<synchronous>, transform_indices = @transform_3, window_bounds = array<i64: 256, 256>}, {pipeline_mode = #tpu.pipeline_mode<synchronous>, transform_indices = @transform_4, window_bounds = array<i64: 1, 256>}, {pipeline_mode = #tpu.pipeline_mode<synchronous>, transform_indices = @transform_5, window_bounds = array<i64: 1, 256>}, {pipeline_mode = #tpu.pipeline_mode<synchronous>, transform_indices = @transform_6, window_bounds = array<i64: 256, 256>}, {pipeline_mode = #tpu.pipeline_mode<synchronous>, transform_indices = @transform_7, window_bounds = array<i64: 1, 256>}, {pipeline_mode = #tpu.pipeline_mode<synchronous>, transform_indices = @transform_8, window_bounds = array<i64: 1, 256>}, {pipeline_mode = #tpu.pipeline_mode<synchronous>, transform_indices = @transform_9, window_bounds = array<i64: 256, 256>}, {pipeline_mode = #tpu.pipeline_mode<synchronous>, transform_indices = @transform_10, window_bounds = array<i64: 1, 256>}, {pipeline_mode = #tpu.pipeline_mode<synchronous>, transform_indices = @transform_11, window_bounds = array<i64: 1, 256>}, {pipeline_mode = #tpu.pipeline_mode<synchronous>, transform_indices = @transform_12, window_bounds = array<i64: 256, 128>}, {pipeline_mode = #tpu.pipeline_mode<synchronous>, transform_indices = @transform_13, window_bounds = array<i64: 1, 128>}, {transform_indices = @transform_14, window_bounds = array<i64: 8, 128>}]} {
    %c0 = arith.constant 0 : index
    %c0_0 = arith.constant 0 : index
    %0 = vector.load %arg1[%c0, %c0_0] : memref<8x256xbf16, #tpu.memory_space<vmem>>, vector<8x256xbf16>
    %c0_1 = arith.constant 0 : index
    %c0_2 = arith.constant 0 : index
    %1 = vector.load %arg2[%c0_1, %c0_2] : memref<256x256xbf16, #tpu.memory_space<vmem>>, vector<256x256xbf16>
    %cst = arith.constant dense<0.000000e+00> : vector<8x256xf32>
    %2 = tpu.matmul %0, %1, %cst {dimension_numbers = #tpu.dot_dimension_numbers<[1], [0], [0], [1], [0, 0, 1, 1], [], []>} : vector<8x256xbf16>, vector<256x256xbf16>, vector<8x256xf32> -> vector<8x256xf32>
    %c0_3 = arith.constant 0 : index
    %c0_4 = arith.constant 0 : index
    %3 = vector.load %arg3[%c0_3, %c0_4] : memref<1x256xf32, #tpu.memory_space<vmem>>, vector<1x256xf32>
    %4 = vector.broadcast %3 : vector<1x256xf32> to vector<8x256xf32>
    %5 = arith.addf %2, %4 : vector<8x256xf32>
    %6 = arith.truncf %5 : vector<8x256xf32> to vector<8x256xbf16>
    %c0_5 = arith.constant 0 : index
    %c0_6 = arith.constant 0 : index
    %7 = vector.load %arg4[%c0_5, %c0_6] : memref<256x256xbf16, #tpu.memory_space<vmem>>, vector<256x256xbf16>
    %cst_7 = arith.constant dense<0.000000e+00> : vector<8x256xf32>
    %8 = tpu.matmul %6, %7, %cst_7 {dimension_numbers = #tpu.dot_dimension_numbers<[1], [0], [0], [1], [0, 0, 1, 1], [], []>} : vector<8x256xbf16>, vector<256x256xbf16>, vector<8x256xf32> -> vector<8x256xf32>
    %c0_8 = arith.constant 0 : index
    %c0_9 = arith.constant 0 : index
    %9 = vector.load %arg5[%c0_8, %c0_9] : memref<1x256xf32, #tpu.memory_space<vmem>>, vector<1x256xf32>
    %10 = vector.broadcast %9 : vector<1x256xf32> to vector<8x256xf32>
    %11 = arith.mulf %8, %10 : vector<8x256xf32>
    %c0_10 = arith.constant 0 : index
    %c0_11 = arith.constant 0 : index
    %12 = vector.load %arg6[%c0_10, %c0_11] : memref<1x256xf32, #tpu.memory_space<vmem>>, vector<1x256xf32>
    %13 = vector.broadcast %12 : vector<1x256xf32> to vector<8x256xf32>
    %14 = arith.addf %11, %13 : vector<8x256xf32>
    %cst_12 = arith.constant 0.000000e+00 : f32
    %15 = vector.broadcast %cst_12 : f32 to vector<8x256xf32>
    %16 = arith.maximumf %14, %15 : vector<8x256xf32>
    %17 = arith.truncf %16 : vector<8x256xf32> to vector<8x256xbf16>
    %c0_13 = arith.constant 0 : index
    %c0_14 = arith.constant 0 : index
    %18 = vector.load %arg7[%c0_13, %c0_14] : memref<256x256xbf16, #tpu.memory_space<vmem>>, vector<256x256xbf16>
    %cst_15 = arith.constant dense<0.000000e+00> : vector<8x256xf32>
    %19 = tpu.matmul %17, %18, %cst_15 {dimension_numbers = #tpu.dot_dimension_numbers<[1], [0], [0], [1], [0, 0, 1, 1], [], []>} : vector<8x256xbf16>, vector<256x256xbf16>, vector<8x256xf32> -> vector<8x256xf32>
    %c0_16 = arith.constant 0 : index
    %c0_17 = arith.constant 0 : index
    %20 = vector.load %arg8[%c0_16, %c0_17] : memref<1x256xf32, #tpu.memory_space<vmem>>, vector<1x256xf32>
    %21 = vector.broadcast %20 : vector<1x256xf32> to vector<8x256xf32>
    %22 = arith.mulf %19, %21 : vector<8x256xf32>
    %c0_18 = arith.constant 0 : index
    %c0_19 = arith.constant 0 : index
    %23 = vector.load %arg9[%c0_18, %c0_19] : memref<1x256xf32, #tpu.memory_space<vmem>>, vector<1x256xf32>
    %24 = vector.broadcast %23 : vector<1x256xf32> to vector<8x256xf32>
    %25 = arith.addf %22, %24 : vector<8x256xf32>
    %cst_20 = arith.constant 0.000000e+00 : f32
    %26 = vector.broadcast %cst_20 : f32 to vector<8x256xf32>
    %27 = arith.maximumf %25, %26 : vector<8x256xf32>
    %28 = arith.truncf %27 : vector<8x256xf32> to vector<8x256xbf16>
    %c0_21 = arith.constant 0 : index
    %c0_22 = arith.constant 0 : index
    %29 = vector.load %arg10[%c0_21, %c0_22] : memref<256x256xbf16, #tpu.memory_space<vmem>>, vector<256x256xbf16>
    %cst_23 = arith.constant dense<0.000000e+00> : vector<8x256xf32>
    %30 = tpu.matmul %28, %29, %cst_23 {dimension_numbers = #tpu.dot_dimension_numbers<[1], [0], [0], [1], [0, 0, 1, 1], [], []>} : vector<8x256xbf16>, vector<256x256xbf16>, vector<8x256xf32> -> vector<8x256xf32>
    %c0_24 = arith.constant 0 : index
    %c0_25 = arith.constant 0 : index
    %31 = vector.load %arg11[%c0_24, %c0_25] : memref<1x256xf32, #tpu.memory_space<vmem>>, vector<1x256xf32>
    %32 = vector.broadcast %31 : vector<1x256xf32> to vector<8x256xf32>
    %33 = arith.mulf %30, %32 : vector<8x256xf32>
    %c0_26 = arith.constant 0 : index
    %c0_27 = arith.constant 0 : index
    %34 = vector.load %arg12[%c0_26, %c0_27] : memref<1x256xf32, #tpu.memory_space<vmem>>, vector<1x256xf32>
    %35 = vector.broadcast %34 : vector<1x256xf32> to vector<8x256xf32>
    %36 = arith.addf %33, %35 : vector<8x256xf32>
    %cst_28 = arith.constant 0.000000e+00 : f32
    %37 = vector.broadcast %cst_28 : f32 to vector<8x256xf32>
    %38 = arith.maximumf %36, %37 : vector<8x256xf32>
    %39 = arith.truncf %38 : vector<8x256xf32> to vector<8x256xbf16>
    %c0_29 = arith.constant 0 : index
    %c0_30 = arith.constant 0 : index
    %40 = vector.load %arg13[%c0_29, %c0_30] : memref<256x128xbf16, #tpu.memory_space<vmem>>, vector<256x128xbf16>
    %cst_31 = arith.constant dense<0.000000e+00> : vector<8x128xf32>
    %41 = tpu.matmul %39, %40, %cst_31 {dimension_numbers = #tpu.dot_dimension_numbers<[1], [0], [0], [1], [0, 0, 1, 1], [], []>} : vector<8x256xbf16>, vector<256x128xbf16>, vector<8x128xf32> -> vector<8x128xf32>
    %c0_32 = arith.constant 0 : index
    %c0_33 = arith.constant 0 : index
    %42 = vector.load %arg14[%c0_32, %c0_33] : memref<1x128xf32, #tpu.memory_space<vmem>>, vector<1x128xf32>
    %43 = vector.broadcast %42 : vector<1x128xf32> to vector<8x128xf32>
    %44 = arith.addf %41, %43 : vector<8x128xf32>
    %c0_34 = arith.constant 0 : index
    %c0_35 = arith.constant 0 : index
    %45 = vector.load %arg15[%c0_34, %c0_35] : memref<8x128xf32, #tpu.memory_space<vmem>>, vector<8x128xf32>
    tpu.vector_store %arg15[%c0_34, %c0_35], %44 {strides = array<i32>} : memref<8x128xf32, #tpu.memory_space<vmem>>, vector<8x128xf32>,
    return
  }
  func.func @transform_0(%arg0: i32) -> (i32, i32) {
    %c0_i32 = arith.constant 0 : i32
    %c0_i32_0 = arith.constant 0 : i32
    return %arg0, %c0_i32 : i32, i32
  }
  func.func @transform_1(%arg0: i32) -> (i32, i32) {
    %c0_i32 = arith.constant 0 : i32
    %c0_i32_0 = arith.constant 0 : i32
    %c0_i32_1 = arith.constant 0 : i32
    return %c0_i32, %c0_i32_0 : i32, i32
  }
  func.func @transform_2(%arg0: i32) -> (i32, i32) {
    %c0_i32 = arith.constant 0 : i32
    %c0_i32_0 = arith.constant 0 : i32
    %c0_i32_1 = arith.constant 0 : i32
    return %c0_i32, %c0_i32_0 : i32, i32
  }
  func.func @transform_3(%arg0: i32) -> (i32, i32) {
    %c0_i32 = arith.constant 0 : i32
    %c0_i32_0 = arith.constant 0 : i32
    %c0_i32_1 = arith.constant 0 : i32
    return %c0_i32, %c0_i32_0 : i32, i32
  }
  func.func @transform_4(%arg0: i32) -> (i32, i32) {
    %c0_i32 = arith.constant 0 : i32
    %c0_i32_0 = arith.constant 0 : i32
    %c0_i32_1 = arith.constant 0 : i32
    return %c0_i32, %c0_i32_0 : i32, i32
  }
  func.func @transform_5(%arg0: i32) -> (i32, i32) {
    %c0_i32 = arith.constant 0 : i32
    %c0_i32_0 = arith.constant 0 : i32
    %c0_i32_1 = arith.constant 0 : i32
    return %c0_i32, %c0_i32_0 : i32, i32
  }
  func.func @transform_6(%arg0: i32) -> (i32, i32) {
    %c0_i32 = arith.constant 0 : i32
    %c0_i32_0 = arith.constant 0 : i32
    %c0_i32_1 = arith.constant 0 : i32
    return %c0_i32, %c0_i32_0 : i32, i32
  }
  func.func @transform_7(%arg0: i32) -> (i32, i32) {
    %c0_i32 = arith.constant 0 : i32
    %c0_i32_0 = arith.constant 0 : i32
    %c0_i32_1 = arith.constant 0 : i32
    return %c0_i32, %c0_i32_0 : i32, i32
  }
  func.func @transform_8(%arg0: i32) -> (i32, i32) {
    %c0_i32 = arith.constant 0 : i32
    %c0_i32_0 = arith.constant 0 : i32
    %c0_i32_1 = arith.constant 0 : i32
    return %c0_i32, %c0_i32_0 : i32, i32
  }
  func.func @transform_9(%arg0: i32) -> (i32, i32) {
    %c0_i32 = arith.constant 0 : i32
    %c0_i32_0 = arith.constant 0 : i32
    %c0_i32_1 = arith.constant 0 : i32
    return %c0_i32, %c0_i32_0 : i32, i32
  }
  func.func @transform_10(%arg0: i32) -> (i32, i32) {
    %c0_i32 = arith.constant 0 : i32
    %c0_i32_0 = arith.constant 0 : i32
    %c0_i32_1 = arith.constant 0 : i32
    return %c0_i32, %c0_i32_0 : i32, i32
  }
  func.func @transform_11(%arg0: i32) -> (i32, i32) {
    %c0_i32 = arith.constant 0 : i32
    %c0_i32_0 = arith.constant 0 : i32
    %c0_i32_1 = arith.constant 0 : i32
    return %c0_i32, %c0_i32_0 : i32, i32
  }
  func.func @transform_12(%arg0: i32) -> (i32, i32) {
    %c0_i32 = arith.constant 0 : i32
    %c0_i32_0 = arith.constant 0 : i32
    %c0_i32_1 = arith.constant 0 : i32
    return %c0_i32, %c0_i32_0 : i32, i32
  }
  func.func @transform_13(%arg0: i32) -> (i32, i32) {
    %c0_i32 = arith.constant 0 : i32
    %c0_i32_0 = arith.constant 0 : i32
    %c0_i32_1 = arith.constant 0 : i32
    return %c0_i32, %c0_i32_0 : i32, i32
  }
  func.func @transform_14(%arg0: i32) -> (i32, i32) {
    %c0_i32 = arith.constant 0 : i32
    %c0_i32_0 = arith.constant 0 : i32
    return %arg0, %c0_i32 : i32, i32
  }
}

module attributes {stable_mosaic.version = 11 : i64} {
  func.func @_mlp_kernel(%arg0: i32, %arg1: memref<8x256xbf16, #tpu.memory_space<vmem>>, %arg2: memref<256x256xbf16, #tpu.memory_space<vmem>>, %arg3: memref<1x256xf32, #tpu.memory_space<vmem>>, %arg4: memref<256x256xbf16, #tpu.memory_space<vmem>>, %arg5: memref<1x256xf32, #tpu.memory_space<vmem>>, %arg6: memref<1x256xf32, #tpu.memory_space<vmem>>, %arg7: memref<256x256xbf16, #tpu.memory_space<vmem>>, %arg8: memref<1x256xf32, #tpu.memory_space<vmem>>, %arg9: memref<1x256xf32, #tpu.memory_space<vmem>>, %arg10: memref<256x256xbf16, #tpu.memory_space<vmem>>, %arg11: memref<1x256xf32, #tpu.memory_space<vmem>>, %arg12: memref<1x256xf32, #tpu.memory_space<vmem>>, %arg13: memref<256x128xbf16, #tpu.memory_space<vmem>>, %arg14: memref<1x128xf32, #tpu.memory_space<vmem>>, %arg15: memref<8x128xf32, #tpu.memory_space<vmem>>) attributes {dimension_semantics = [#tpu.dimension_semantics<parallel>], iteration_bounds = array<i64: 1>, scalar_prefetch = 0 : i64, scratch_operands = 0 : i64, tpu.core_type = #tpu.core_type<tc>, window_params = [{transform_indices = @transform_0, window_bounds = array<i64: 8, 256>}, {pipeline_mode = #tpu.pipeline_mode<synchronous>, transform_indices = @transform_1, window_bounds = array<i64: 256, 256>}, {pipeline_mode = #tpu.pipeline_mode<synchronous>, transform_indices = @transform_2, window_bounds = array<i64: 1, 256>}, {pipeline_mode = #tpu.pipeline_mode<synchronous>, transform_indices = @transform_3, window_bounds = array<i64: 256, 256>}, {pipeline_mode = #tpu.pipeline_mode<synchronous>, transform_indices = @transform_4, window_bounds = array<i64: 1, 256>}, {pipeline_mode = #tpu.pipeline_mode<synchronous>, transform_indices = @transform_5, window_bounds = array<i64: 1, 256>}, {pipeline_mode = #tpu.pipeline_mode<synchronous>, transform_indices = @transform_6, window_bounds = array<i64: 256, 256>}, {pipeline_mode = #tpu.pipeline_mode<synchronous>, transform_indices = @transform_7, window_bounds = array<i64: 1, 256>}, {pipeline_mode = #tpu.pipeline_mode<synchronous>, transform_indices = @transform_8, window_bounds = array<i64: 1, 256>}, {pipeline_mode = #tpu.pipeline_mode<synchronous>, transform_indices = @transform_9, window_bounds = array<i64: 256, 256>}, {pipeline_mode = #tpu.pipeline_mode<synchronous>, transform_indices = @transform_10, window_bounds = array<i64: 1, 256>}, {pipeline_mode = #tpu.pipeline_mode<synchronous>, transform_indices = @transform_11, window_bounds = array<i64: 1, 256>}, {pipeline_mode = #tpu.pipeline_mode<synchronous>, transform_indices = @transform_12, window_bounds = array<i64: 256, 128>}, {pipeline_mode = #tpu.pipeline_mode<synchronous>, transform_indices = @transform_13, window_bounds = array<i64: 1, 128>}, {transform_indices = @transform_14, window_bounds = array<i64: 8, 128>}]} {
    %c0 = arith.constant 0 : index
    %c0_0 = arith.constant 0 : index
    %0 = vector.load %arg1[%c0, %c0_0] : memref<8x256xbf16, #tpu.memory_space<vmem>>, vector<8x256xbf16>
    %c0_1 = arith.constant 0 : index
    %c0_2 = arith.constant 0 : index
    %1 = vector.load %arg2[%c0_1, %c0_2] : memref<256x256xbf16, #tpu.memory_space<vmem>>, vector<256x256xbf16>
    %cst = arith.constant dense<0.000000e+00> : vector<8x256xf32>
    %2 = tpu.matmul %0, %1, %cst {dimension_numbers = #tpu.dot_dimension_numbers<[1], [0], [0], [1], [0, 0, 1, 1], [], []>} : vector<8x256xbf16>, vector<256x256xbf16>, vector<8x256xf32> -> vector<8x256xf32>
    %c0_3 = arith.constant 0 : index
    %c0_4 = arith.constant 0 : index
    %3 = vector.load %arg3[%c0_3, %c0_4] : memref<1x256xf32, #tpu.memory_space<vmem>>, vector<1x256xf32>
    %4 = vector.broadcast %3 : vector<1x256xf32> to vector<8x256xf32>
    %5 = arith.addf %2, %4 : vector<8x256xf32>
    %6 = arith.truncf %5 : vector<8x256xf32> to vector<8x256xbf16>
    %c0_5 = arith.constant 0 : index
    %c0_6 = arith.constant 0 : index
    %7 = vector.load %arg4[%c0_5, %c0_6] : memref<256x256xbf16, #tpu.memory_space<vmem>>, vector<256x256xbf16>
    %cst_7 = arith.constant dense<0.000000e+00> : vector<8x256xf32>
    %8 = tpu.matmul %6, %7, %cst_7 {dimension_numbers = #tpu.dot_dimension_numbers<[1], [0], [0], [1], [0, 0, 1, 1], [], []>} : vector<8x256xbf16>, vector<256x256xbf16>, vector<8x256xf32> -> vector<8x256xf32>
    %c0_8 = arith.constant 0 : index
    %c0_9 = arith.constant 0 : index
    %9 = vector.load %arg5[%c0_8, %c0_9] : memref<1x256xf32, #tpu.memory_space<vmem>>, vector<1x256xf32>
    %10 = vector.broadcast %9 : vector<1x256xf32> to vector<8x256xf32>
    %11 = arith.mulf %8, %10 : vector<8x256xf32>
    %c0_10 = arith.constant 0 : index
    %c0_11 = arith.constant 0 : index
    %12 = vector.load %arg6[%c0_10, %c0_11] : memref<1x256xf32, #tpu.memory_space<vmem>>, vector<1x256xf32>
    %13 = vector.broadcast %12 : vector<1x256xf32> to vector<8x256xf32>
    %14 = arith.addf %11, %13 : vector<8x256xf32>
    %cst_12 = arith.constant 0.000000e+00 : f32
    %15 = vector.broadcast %cst_12 : f32 to vector<8x256xf32>
    %16 = arith.maximumf %14, %15 : vector<8x256xf32>
    %17 = arith.truncf %16 : vector<8x256xf32> to vector<8x256xbf16>
    %c0_13 = arith.constant 0 : index
    %c0_14 = arith.constant 0 : index
    %18 = vector.load %arg7[%c0_13, %c0_14] : memref<256x256xbf16, #tpu.memory_space<vmem>>, vector<256x256xbf16>
    %cst_15 = arith.constant dense<0.000000e+00> : vector<8x256xf32>
    %19 = tpu.matmul %17, %18, %cst_15 {dimension_numbers = #tpu.dot_dimension_numbers<[1], [0], [0], [1], [0, 0, 1, 1], [], []>} : vector<8x256xbf16>, vector<256x256xbf16>, vector<8x256xf32> -> vector<8x256xf32>
    %c0_16 = arith.constant 0 : index
    %c0_17 = arith.constant 0 : index
    %20 = vector.load %arg8[%c0_16, %c0_17] : memref<1x256xf32, #tpu.memory_space<vmem>>, vector<1x256xf32>
    %21 = vector.broadcast %20 : vector<1x256xf32> to vector<8x256xf32>
    %22 = arith.mulf %19, %21 : vector<8x256xf32>
    %c0_18 = arith.constant 0 : index
    %c0_19 = arith.constant 0 : index
    %23 = vector.load %arg9[%c0_18, %c0_19] : memref<1x256xf32, #tpu.memory_space<vmem>>, vector<1x256xf32>
    %24 = vector.broadcast %23 : vector<1x256xf32> to vector<8x256xf32>
    %25 = arith.addf %22, %24 : vector<8x256xf32>
    %cst_20 = arith.constant 0.000000e+00 : f32
    %26 = vector.broadcast %cst_20 : f32 to vector<8x256xf32>
    %27 = arith.maximumf %25, %26 : vector<8x256xf32>
    %28 = arith.truncf %27 : vector<8x256xf32> to vector<8x256xbf16>
    %c0_21 = arith.constant 0 : index
    %c0_22 = arith.constant 0 : index
    %29 = vector.load %arg10[%c0_21, %c0_22] : memref<256x256xbf16, #tpu.memory_space<vmem>>, vector<256x256xbf16>
    %cst_23 = arith.constant dense<0.000000e+00> : vector<8x256xf32>
    %30 = tpu.matmul %28, %29, %cst_23 {dimension_numbers = #tpu.dot_dimension_numbers<[1], [0], [0], [1], [0, 0, 1, 1], [], []>} : vector<8x256xbf16>, vector<256x256xbf16>, vector<8x256xf32> -> vector<8x256xf32>
    %c0_24 = arith.constant 0 : index
    %c0_25 = arith.constant 0 : index
    %31 = vector.load %arg11[%c0_24, %c0_25] : memref<1x256xf32, #tpu.memory_space<vmem>>, vector<1x256xf32>
    %32 = vector.broadcast %31 : vector<1x256xf32> to vector<8x256xf32>
    %33 = arith.mulf %30, %32 : vector<8x256xf32>
    %c0_26 = arith.constant 0 : index
    %c0_27 = arith.constant 0 : index
    %34 = vector.load %arg12[%c0_26, %c0_27] : memref<1x256xf32, #tpu.memory_space<vmem>>, vector<1x256xf32>
    %35 = vector.broadcast %34 : vector<1x256xf32> to vector<8x256xf32>
    %36 = arith.addf %33, %35 : vector<8x256xf32>
    %cst_28 = arith.constant 0.000000e+00 : f32
    %37 = vector.broadcast %cst_28 : f32 to vector<8x256xf32>
    %38 = arith.maximumf %36, %37 : vector<8x256xf32>
    %39 = arith.truncf %38 : vector<8x256xf32> to vector<8x256xbf16>
    %c0_29 = arith.constant 0 : index
    %c0_30 = arith.constant 0 : index
    %40 = vector.load %arg13[%c0_29, %c0_30] : memref<256x128xbf16, #tpu.memory_space<vmem>>, vector<256x128xbf16>
    %cst_31 = arith.constant dense<0.000000e+00> : vector<8x128xf32>
    %41 = tpu.matmul %39, %40, %cst_31 {dimension_numbers = #tpu.dot_dimension_numbers<[1], [0], [0], [1], [0, 0, 1, 1], [], []>} : vector<8x256xbf16>, vector<256x128xbf16>, vector<8x128xf32> -> vector<8x128xf32>
    %c0_32 = arith.constant 0 : index
    %c0_33 = arith.constant 0 : index
    %42 = vector.load %arg14[%c0_32, %c0_33] : memref<1x128xf32, #tpu.memory_space<vmem>>, vector<1x128xf32>
    %43 = vector.broadcast %42 : vector<1x128xf32> to vector<8x128xf32>
    %44 = arith.addf %41, %43 : vector<8x128xf32>
    %c0_34 = arith.constant 0 : index
    %c0_35 = arith.constant 0 : index
    %45 = vector.load %arg15[%c0_34, %c0_35] : memref<8x128xf32, #tpu.memory_space<vmem>>, vector<8x128xf32>
    tpu.vector_store %arg15[%c0_34, %c0_35], %44 {strides = array<i32>} : memref<8x128xf32, #tpu.memory_space<vmem>>, vector<8x128xf32>,
    return
  }
  func.func @transform_0(%arg0: i32) -> (i32, i32) {
    %c0_i32 = arith.constant 0 : i32
    %c0_i32_0 = arith.constant 0 : i32
    return %arg0, %c0_i32 : i32, i32
  }
  func.func @transform_1(%arg0: i32) -> (i32, i32) {
    %c0_i32 = arith.constant 0 : i32
    %c0_i32_0 = arith.constant 0 : i32
    %c0_i32_1 = arith.constant 0 : i32
    return %c0_i32, %c0_i32_0 : i32, i32
  }
  func.func @transform_2(%arg0: i32) -> (i32, i32) {
    %c0_i32 = arith.constant 0 : i32
    %c0_i32_0 = arith.constant 0 : i32
    %c0_i32_1 = arith.constant 0 : i32
    return %c0_i32, %c0_i32_0 : i32, i32
  }
  func.func @transform_3(%arg0: i32) -> (i32, i32) {
    %c0_i32 = arith.constant 0 : i32
    %c0_i32_0 = arith.constant 0 : i32
    %c0_i32_1 = arith.constant 0 : i32
    return %c0_i32, %c0_i32_0 : i32, i32
  }
  func.func @transform_4(%arg0: i32) -> (i32, i32) {
    %c0_i32 = arith.constant 0 : i32
    %c0_i32_0 = arith.constant 0 : i32
    %c0_i32_1 = arith.constant 0 : i32
    return %c0_i32, %c0_i32_0 : i32, i32
  }
  func.func @transform_5(%arg0: i32) -> (i32, i32) {
    %c0_i32 = arith.constant 0 : i32
    %c0_i32_0 = arith.constant 0 : i32
    %c0_i32_1 = arith.constant 0 : i32
    return %c0_i32, %c0_i32_0 : i32, i32
  }
  func.func @transform_6(%arg0: i32) -> (i32, i32) {
    %c0_i32 = arith.constant 0 : i32
    %c0_i32_0 = arith.constant 0 : i32
    %c0_i32_1 = arith.constant 0 : i32
    return %c0_i32, %c0_i32_0 : i32, i32
  }
  func.func @transform_7(%arg0: i32) -> (i32, i32) {
    %c0_i32 = arith.constant 0 : i32
    %c0_i32_0 = arith.constant 0 : i32
    %c0_i32_1 = arith.constant 0 : i32
    return %c0_i32, %c0_i32_0 : i32, i32
  }
  func.func @transform_8(%arg0: i32) -> (i32, i32) {
    %c0_i32 = arith.constant 0 : i32
    %c0_i32_0 = arith.constant 0 : i32
    %c0_i32_1 = arith.constant 0 : i32
    return %c0_i32, %c0_i32_0 : i32, i32
  }
  func.func @transform_9(%arg0: i32) -> (i32, i32) {
    %c0_i32 = arith.constant 0 : i32
    %c0_i32_0 = arith.constant 0 : i32
    %c0_i32_1 = arith.constant 0 : i32
    return %c0_i32, %c0_i32_0 : i32, i32
  }
  func.func @transform_10(%arg0: i32) -> (i32, i32) {
    %c0_i32 = arith.constant 0 : i32
    %c0_i32_0 = arith.constant 0 : i32
    %c0_i32_1 = arith.constant 0 : i32
    return %c0_i32, %c0_i32_0 : i32, i32
  }
  func.func @transform_11(%arg0: i32) -> (i32, i32) {
    %c0_i32 = arith.constant 0 : i32
    %c0_i32_0 = arith.constant 0 : i32
    %c0_i32_1 = arith.constant 0 : i32
    return %c0_i32, %c0_i32_0 : i32, i32
  }
  func.func @transform_12(%arg0: i32) -> (i32, i32) {
    %c0_i32 = arith.constant 0 : i32
    %c0_i32_0 = arith.constant 0 : i32
    %c0_i32_1 = arith.constant 0 : i32
    return %c0_i32, %c0_i32_0 : i32, i32
  }
  func.func @transform_13(%arg0: i32) -> (i32, i32) {
    %c0_i32 = arith.constant 0 : i32
    %c0_i32_0 = arith.constant 0 : i32
    %c0_i32_1 = arith.constant 0 : i32
    return %c0_i32, %c0_i32_0 : i32, i32
  }
  func.func @transform_14(%arg0: i32) -> (i32, i32) {
    %c0_i32 = arith.constant 0 : i32
    %c0_i32_0 = arith.constant 0 : i32
    return %arg0, %c0_i32 : i32, i32
  }
}

</mosaic_0001>

<bundles_post_ra>
// kernel: tpu_custom_call.1
= control target key start
LH: loop header
LB: loop body
LE: loop exit
PB: predicated region body
PF: predicated region fallthrough
CT: control target
= control target key end

     0   :  { %19 = vsyncpa [#allocation3], 0  ;;  %s2157_s0 = inlined_call_operand.hbm [shape: bf16[8,256], index: 0, kind: input, shape index: {}]   ;;  %s2158_s1 = inlined_call_operand.hbm [shape: bf16[256,256], index: 1, kind: input, shape index: {}]   ;;  %s2159_s2 = inlined_call_operand.vmem [shape: f32[1,256], index: 2, kind: input, shape index: {}]   ;;  %s2160_s3 = inlined_call_operand.hbm [shape: bf16[256,256], index: 3, kind: input, shape index: {}]   ;;  %s2161_s4 = inlined_call_operand.vmem [shape: f32[1,256], index: 4, kind: input, shape index: {}]   ;;  %s2162_s5 = inlined_call_operand.vmem [shape: f32[1,256], index: 5, kind: input, shape index: {}]   ;;  %s2163_s6 = inlined_call_operand.hbm [shape: bf16[256,256], index: 6, kind: input, shape index: {}]   ;;  %s2164_s7 = inlined_call_operand.vmem [shape: f32[1,256], index: 7, kind: input, shape index: {}]   ;;  %s2165_s8 = inlined_call_operand.vmem [shape: f32[1,256], index: 8, kind: input, shape index: {}]   ;;  %s2166_s9 = inlined_call_operand.hbm [shape: bf16[256,256], index: 9, kind: input, shape index: {}]   ;;  %s2167_s10 = inlined_call_operand.vmem [shape: f32[1,256], index: 10, kind: input, shape index: {}]   ;;  %s2168_s11 = inlined_call_operand.vmem [shape: f32[1,256], index: 11, kind: input, shape index: {}]   ;;  %s2169_s12 = inlined_call_operand.hbm [shape: bf16[256,128], index: 12, kind: input, shape index: {}]   ;;  %s2170_s13 = inlined_call_operand.vmem [shape: f32[1,128], index: 13, kind: input, shape index: {}]   ;;  %s2171_s14 = inlined_call_operand.hbm [shape: f32[8,128], index: 14, kind: output, shape index: {}]  }
   0x1   :  { %20 = vsyncpa [#allocation6], 0 }
   0x2   :  { %21 = vsyncpa [#allocation9], 0 }
   0x3   :  { %22 = vsyncpa [#allocation12], 0 }
   0x4   :  { %23 = vsyncpa [#allocation4], 0  ;;  %s1927_s29 = smov [#allocation5]   ;;  %s1763_s17 = scalar_lea.hbm %s2158_s1, 4096 }
   0x5   :  { %s39_s30 = sshll.u32 %s1927_s29, 4  ;;  %p1764_p0 = scmp.ne.s32.totalorder %s2158_s1, %s1763_s17  ;;  %s40_s30 = int_to_ptr.vmem [resolvable:$true] %s39_s30 }
   0x6   :  { %p1767_p1 = scmp.lt.u32.totalorder %s1763_s17, %s2158_s1 }
   0x8   :  { %p1769_p2 = pnand %p1767_p1, %p1764_p0 }
   0xa   :  { %1772 = shalt.err (!%p1769_p2)
}
   0xb   :  { %s1773_s22 = scalar_lea.vmem %s40_s30, 4096  ;;  %p1778_p4 = scmp.lt.s32.totalorder %s40_s30, %s40_s30 }
   0xc   :  { %p1774_p3 = scmp.ne.s32.totalorder %s40_s30, %s1773_s22  ;;  %p1779_p5 = scmp.lt.s32.totalorder %s1773_s22, %s1773_s22 }
   0xe   :  { %p1780_p6 = por %p1779_p5, %p1778_p4 }
  0x10   :  { %p1781_p7 = pnand %p1780_p6, %p1774_p3 }
  0x12   :  { %1784 = shalt.err (!%p1781_p7)
}
  0x13   :  { %s1928_s23 = smov 128   ;;  %s1929_s24 = smov 8  }
  0x14   :  { %45 = dma.hbm_to_vmem [thread:$0]  %s2158_s1, 4096, %s40_s30, [#allocation6], %s1928_s23, %s1928_s23, %s1929_s24  }
  0x15   :  { %s1930_s27 = smov [#allocation8]   ;;  %s1931_s29 = smov [#allocation2]  }
  0x16   :  { %s69_s28 = sshll.u32 %s1930_s27, 4  ;;  %s30_s15 = sshll.u32 %s1931_s29, 4  ;;  %s70_s28 = int_to_ptr.vmem [resolvable:$true] %s69_s28  ;;  %s31_s15 = int_to_ptr.vmem [resolvable:$true] %s30_s15 }
  0x17   :  { %s1785_s18 = scalar_lea.hbm %s2163_s6, 4096 }
  0x18   :  { %p1786_p8 = scmp.ne.s32.totalorder %s2163_s6, %s1785_s18  ;;  %p1789_p9 = scmp.lt.u32.totalorder %s1785_s18, %s2163_s6 }
  0x1a   :  { %p1791_p10 = pnand %p1789_p9, %p1786_p8 }
  0x1c   :  { %1794 = shalt.err (!%p1791_p10)
}
  0x1d   :  { %s1795_s1 = scalar_lea.vmem %s70_s28, 4096  ;;  %p1800_p12 = scmp.lt.s32.totalorder %s70_s28, %s70_s28 }
  0x1e   :  { %p1796_p11 = scmp.ne.s32.totalorder %s70_s28, %s1795_s1  ;;  %p1801_p13 = scmp.lt.s32.totalorder %s1795_s1, %s1795_s1 }
  0x20   :  { %p1802_p0 = por %p1801_p13, %p1800_p12 }
  0x22   :  { %p1803_p1 = pnand %p1802_p0, %p1796_p11 }
  0x24   :  { %1806 = shalt.err (!%p1803_p1)
}
  0x25   :  { %75 = dma.hbm_to_vmem [thread:$0]  %s2163_s6, 4096, %s70_s28, [#allocation9], %s1928_s23, %s1928_s23, %s1929_s24  }
  0x26   :  { %s1807_s29 = scalar_lea.hbm %s2157_s0, 128 }
  0x27   :  { %p1808_p2 = scmp.ne.s32.totalorder %s2157_s0, %s1807_s29  ;;  %p1811_p3 = scmp.lt.u32.totalorder %s1807_s29, %s2157_s0 }
  0x29   :  { %p1813_p4 = pnand %p1811_p3, %p1808_p2 }
  0x2b   :  { %1816 = shalt.err (!%p1813_p4)
}
  0x2c   :  { %s1817_s20 = scalar_lea.vmem %s31_s15, 128  ;;  %p1822_p6 = scmp.lt.s32.totalorder %s31_s15, %s31_s15 }
  0x2d   :  { %p1818_p5 = scmp.ne.s32.totalorder %s31_s15, %s1817_s20  ;;  %p1823_p7 = scmp.lt.s32.totalorder %s1817_s20, %s1817_s20 }
  0x2f   :  { %p1824_p8 = por %p1823_p7, %p1822_p6 }
  0x31   :  { %p1825_p9 = pnand %p1824_p8, %p1818_p5 }
  0x33   :  { %1828 = shalt.err (!%p1825_p9)
}
  0x34   :  { %33 = dma.hbm_to_vmem [thread:$0]  %s2157_s0, 128, %s31_s15, [#allocation3]  }
  0x35   :  { %s1932_s21 = smov [#allocation7]   ;;  %s1933_s1 = smov [#allocation10]  }
  0x36   :  { %s53_s22 = sshll.u32 %s1932_s21, 4  ;;  %s85_s30 = sshll.u32 %s1933_s1, 4  ;;  %s54_s22 = int_to_ptr.vmem [resolvable:$true] %s53_s22  ;;  %s86_s30 = int_to_ptr.vmem [resolvable:$true] %s85_s30 }
  0x37   :  { %s1829_s27 = scalar_lea.hbm %s2160_s3, 4096 }
  0x38   :  { %p1830_p10 = scmp.ne.s32.totalorder %s2160_s3, %s1829_s27  ;;  %p1833_p11 = scmp.lt.u32.totalorder %s1829_s27, %s2160_s3 }
  0x3a   :  { %p1835_p12 = pnand %p1833_p11, %p1830_p10 }
  0x3c   :  { %1838 = shalt.err (!%p1835_p12)
}
  0x3d   :  { %s1839_s0 = scalar_lea.vmem %s54_s22, 4096  ;;  %p1844_p0 = scmp.lt.s32.totalorder %s54_s22, %s54_s22 }
  0x3e   :  { %p1840_p13 = scmp.ne.s32.totalorder %s54_s22, %s1839_s0  ;;  %p1845_p1 = scmp.lt.s32.totalorder %s1839_s0, %s1839_s0 }
  0x40   :  { %p1846_p2 = por %p1845_p1, %p1844_p0 }
  0x42   :  { %p1847_p3 = pnand %p1846_p2, %p1840_p13 }
  0x44   :  { %1850 = shalt.err (!%p1847_p3)
}
  0x45   :  { %59 = dma.hbm_to_vmem [thread:$0]  %s2160_s3, 4096, %s54_s22, [#allocation6], %s1928_s23, %s1928_s23, %s1929_s24  }
  0x46   :  { %s1851_s28 = scalar_lea.hbm %s2166_s9, 4096 }
  0x47   :  { %p1852_p4 = scmp.ne.s32.totalorder %s2166_s9, %s1851_s28  ;;  %p1855_p5 = scmp.lt.u32.totalorder %s1851_s28, %s2166_s9 }
  0x49   :  { %p1857_p6 = pnand %p1855_p5, %p1852_p4 }
  0x4b   :  { %1860 = shalt.err (!%p1857_p6)
}
  0x4c   :  { %s1861_s27 = scalar_lea.vmem %s86_s30, 4096  ;;  %p1866_p8 = scmp.lt.s32.totalorder %s86_s30, %s86_s30 }
  0x4d   :  { %p1862_p7 = scmp.ne.s32.totalorder %s86_s30, %s1861_s27  ;;  %p1867_p9 = scmp.lt.s32.totalorder %s1861_s27, %s1861_s27 }
  0x4f   :  { %p1868_p10 = por %p1867_p9, %p1866_p8 }
  0x51   :  { %p1869_p11 = pnand %p1868_p10, %p1862_p7 }
  0x53   :  { %1872 = shalt.err (!%p1869_p11)
}
  0x54   :  { %91 = dma.hbm_to_vmem [thread:$0]  %s2166_s9, 4096, %s86_s30, [#allocation9], %s1928_s23, %s1928_s23, %s1929_s24  }
  0x55   :  { %s1934_s29 = smov [#allocation11]   ;;  %s1873_s0 = scalar_lea.hbm %s2169_s12, 2048 }
  0x56   :  { %s101_s16 = sshll.u32 %s1934_s29, 4  ;;  %p1874_p12 = scmp.ne.s32.totalorder %s2169_s12, %s1873_s0  ;;  %s102_s16 = int_to_ptr.vmem [resolvable:$true] %s101_s16 }
  0x57   :  { %p1877_p13 = scmp.lt.u32.totalorder %s1873_s0, %s2169_s12 }
  0x59   :  { %p1879_p0 = pnand %p1877_p13, %p1874_p12 }
  0x5b   :  { %1882 = shalt.err (!%p1879_p0)
}
  0x5c   :  { %s1883_s28 = scalar_lea.vmem %s102_s16, 2048  ;;  %p1888_p2 = scmp.lt.s32.totalorder %s102_s16, %s102_s16 }
  0x5d   :  { %p1884_p1 = scmp.ne.s32.totalorder %s102_s16, %s1883_s28  ;;  %p1889_p3 = scmp.lt.s32.totalorder %s1883_s28, %s1883_s28 }
  0x5f   :  { %p1890_p4 = por %p1889_p3, %p1888_p2 }
  0x61   :  { %p1891_p5 = pnand %p1890_p4, %p1884_p1 }
  0x63   :  { %1894 = shalt.err (!%p1891_p5)
}
  0x64   :  { %s1935_s9 = smov 64   ;;  %s1936_s23 = smov 4  }
  0x65   :  { %107 = dma.hbm_to_vmem [thread:$0]  %s2169_s12, 2048, %s102_s16, [#allocation12], %s1935_s9, %s1935_s9, %s1936_s23  }
  0x66   :  { %1917 = dma.done.wait [#allocation3], 128  }
  0x67   :  { %1918 = vsyncadd [#allocation3], 4294967168 }
  0x68   :  { %1919 = dma.done.wait [#allocation6], 8192  }
  0x69   :  { %1920 = vsyncadd [#allocation6], 4294959104 }
  0x6a   :  { %1921 = dma.done.wait [#allocation9], 8192  }
  0x6b   :  { %1922 = vsyncadd [#allocation9], 4294959104 }
  0x6c   :  { %1923 = dma.done.wait [#allocation12], 2048  }
  0x6d   :  { %1924 = vsyncadd [#allocation12], 4294965248  ;;  %v1553_v0 = vld [vmem:[#allocation5 + $0x4] ss:$8 sps:$4 sm:$0xff]   ;;  %v1555_v1 = vld [vmem:[#allocation5] ss:$8 sps:$4 sm:$0xff]  }
  0x6e   :  { %341 = vmatprep.subr.bf16.mxu0 %v1553_v0  ;;  %v1556_v2 = vld [vmem:[#allocation5 + $0x14] ss:$8 sps:$4 sm:$0xff]   ;;  %v1558_v3 = vld [vmem:[#allocation5 + $0x10] ss:$8 sps:$4 sm:$0xff]   ;;  %v1559_v4 = vld [vmem:[#allocation5 + $0x24] ss:$8 sps:$4 sm:$0xff]  }
  0x6f   :  { %342 = vmatpush1.bf16.msra.mxu0 %v1555_v1  ;;  %v1561_v5 = vld [vmem:[#allocation5 + $0x20] ss:$8 sps:$4 sm:$0xff]   ;;  %v1562_v6 = vld [vmem:[#allocation5 + $0x34] ss:$8 sps:$4 sm:$0xff]   ;;  %v1564_v7 = vld [vmem:[#allocation5 + $0x30] ss:$8 sps:$4 sm:$0xff]  }
  0x70   :  { %343 = vmatprep.subr.bf16.mxu0 %v1556_v2  ;;  %v1565_v8 = vld [vmem:[#allocation5 + $0x44] ss:$8 sps:$4 sm:$0xff]   ;;  %v1567_v9 = vld [vmem:[#allocation5 + $0x40] ss:$8 sps:$4 sm:$0xff]   ;;  %v1568_v10 = vld [vmem:[#allocation5 + $0x54] ss:$8 sps:$4 sm:$0xff]  }
  0x71   :  { %v1570_v11 = vld [vmem:[#allocation5 + $0x50] ss:$8 sps:$4 sm:$0xff]   ;;  %v1571_v12 = vld [vmem:[#allocation5 + $0x64] ss:$8 sps:$4 sm:$0xff]   ;;  %v1573_v13 = vld [vmem:[#allocation5 + $0x60] ss:$8 sps:$4 sm:$0xff]  }
  0x72   :  { %v2097_v14 = vld [vmem:[#allocation2] sm:$0xff]  ;;  %v1603_v16 = vld [vmem:[#allocation7 + $0x4] ss:$8 sps:$4 sm:$0xff]   ;;  %v1605_v17 = vld [vmem:[#allocation7] ss:$8 sps:$4 sm:$0xff]   ;;  %s1937_s16 = smov [#allocation13]  }
  0x73   :  { %344 = vmatpush1.bf16.msra.mxu0 %v1558_v3  ;;  %v1374_v15 = vcombine.high %v2097_v14, %v2097_v14  ;;  %v1606_v18 = vld [vmem:[#allocation7 + $0x14] ss:$8 sps:$4 sm:$0xff]   ;;  %576 = vmatprep.subr.bf16.mxu1 %v1603_v16  ;;  %v1576_v20 = vld [vmem:[#allocation5 + $0x70] ss:$8 sps:$4 sm:$0xff]   ;;  %v1609_v22 = vld [vmem:[#allocation7 + $0x24] ss:$8 sps:$4 sm:$0xff]   ;;  %v1373_v57 = vcombine.low %v2097_v14, %v2097_v14 }
  0x74   :  { %345 = vmatprep.subr.bf16.mxu0 %v1559_v4  ;;  %v1574_v19 = vld [vmem:[#allocation5 + $0x74] ss:$8 sps:$4 sm:$0xff]   ;;  %577 = vmatpush1.bf16.msra.mxu1 %v1605_v17  ;;  %v1608_v21 = vld [vmem:[#allocation7 + $0x10] ss:$8 sps:$4 sm:$0xff]   ;;  %v1577_v23 = vld [vmem:[#allocation5 + $0x84] ss:$8 sps:$4 sm:$0xff]  }
  0x75   :  { %373 = vmatprep.mubr.bf16.mxu0 %v1374_v15  ;;  %578 = vmatprep.subr.bf16.mxu1 %v1606_v18  ;;  %v1579_v24 = vld [vmem:[#allocation5 + $0x80] ss:$8 sps:$4 sm:$0xff]   ;;  %v1612_v26 = vld [vmem:[#allocation7 + $0x34] ss:$8 sps:$4 sm:$0xff]   ;;  %v1582_v28 = vld [vmem:[#allocation5 + $0x90] ss:$8 sps:$4 sm:$0xff]  }
  0x76   :  { %v1611_v25 = vld [vmem:[#allocation7 + $0x20] ss:$8 sps:$4 sm:$0xff]   ;;  %v1580_v27 = vld [vmem:[#allocation5 + $0x94] ss:$8 sps:$4 sm:$0xff]   ;;  %v1614_v29 = vld [vmem:[#allocation7 + $0x30] ss:$8 sps:$4 sm:$0xff]  }
  0x77   :  { %346 = vmatpush1.bf16.msra.mxu0 %v1561_v5  ;;  %v1615_v30 = vld [vmem:[#allocation7 + $0x44] ss:$8 sps:$4 sm:$0xff]   ;;  %v1585_v32 = vld [vmem:[#allocation5 + $0xa0] ss:$8 sps:$4 sm:$0xff]   ;;  %v1618_v34 = vld [vmem:[#allocation7 + $0x54] ss:$8 sps:$4 sm:$0xff]  }
  0x78   :  { %347 = vmatprep.subr.bf16.mxu0 %v1562_v6  ;;  %579 = vmatpush1.bf16.msra.mxu1 %v1608_v21  ;;  %v1583_v31 = vld [vmem:[#allocation5 + $0xa4] ss:$8 sps:$4 sm:$0xff]   ;;  %v1617_v33 = vld [vmem:[#allocation7 + $0x40] ss:$8 sps:$4 sm:$0xff]   ;;  %v1586_v35 = vld [vmem:[#allocation5 + $0xb4] ss:$8 sps:$4 sm:$0xff]  }
  0x79   :  { %580 = vmatprep.subr.bf16.mxu1 %v1609_v22  ;;  %v1588_v36 = vld [vmem:[#allocation5 + $0xb0] ss:$8 sps:$4 sm:$0xff]   ;;  %v1621_v38 = vld [vmem:[#allocation7 + $0x64] ss:$8 sps:$4 sm:$0xff]   ;;  %v1623_v40 = vld [vmem:[#allocation7 + $0x60] ss:$8 sps:$4 sm:$0xff]  }
  0x7a   :  { %v1620_v37 = vld [vmem:[#allocation7 + $0x50] ss:$8 sps:$4 sm:$0xff]   ;;  %v1589_v39 = vld [vmem:[#allocation5 + $0xc4] ss:$8 sps:$4 sm:$0xff]   ;;  %v1591_v41 = vld [vmem:[#allocation5 + $0xc0] ss:$8 sps:$4 sm:$0xff]  }
  0x7b   :  { %348 = vmatpush1.bf16.msra.mxu0 %v1564_v7  ;;  %v1624_v42 = vld [vmem:[#allocation7 + $0x74] ss:$8 sps:$4 sm:$0xff]   ;;  %v1626_v44 = vld [vmem:[#allocation7 + $0x70] ss:$8 sps:$4 sm:$0xff]   ;;  %v1627_v46 = vld [vmem:[#allocation7 + $0x84] ss:$8 sps:$4 sm:$0xff]  }
  0x7c   :  { %349 = vmatprep.subr.bf16.mxu0 %v1565_v8  ;;  %581 = vmatpush1.bf16.msra.mxu1 %v1611_v25  ;;  %v1592_v43 = vld [vmem:[#allocation5 + $0xd4] ss:$8 sps:$4 sm:$0xff]   ;;  %v1594_v45 = vld [vmem:[#allocation5 + $0xd0] ss:$8 sps:$4 sm:$0xff]   ;;  %v1595_v47 = vld [vmem:[#allocation5 + $0xe4] ss:$8 sps:$4 sm:$0xff]  }
  0x7d   :  { %582 = vmatprep.subr.bf16.mxu1 %v1612_v26  ;;  %v1629_v48 = vld [vmem:[#allocation7 + $0x80] ss:$8 sps:$4 sm:$0xff]   ;;  %v1630_v50 = vld [vmem:[#allocation7 + $0x94] ss:$8 sps:$4 sm:$0xff]   ;;  %v1632_v52 = vld [vmem:[#allocation7 + $0x90] ss:$8 sps:$4 sm:$0xff]  }
  0x7e   :  { %v1597_v49 = vld [vmem:[#allocation5 + $0xe0] ss:$8 sps:$4 sm:$0xff]   ;;  %v1598_v51 = vld [vmem:[#allocation5 + $0xf4] ss:$8 sps:$4 sm:$0xff]   ;;  %v1600_v53 = vld [vmem:[#allocation5 + $0xf0] ss:$8 sps:$4 sm:$0xff]  }
  0x7f   :  { %350 = vmatpush1.bf16.msra.mxu0 %v1567_v9  ;;  %v1633_v54 = vld [vmem:[#allocation7 + $0xa4] ss:$8 sps:$4 sm:$0xff]   ;;  %v1635_v55 = vld [vmem:[#allocation7 + $0xa0] ss:$8 sps:$4 sm:$0xff]   ;;  %v1636_v56 = vld [vmem:[#allocation7 + $0xb4] ss:$8 sps:$4 sm:$0xff]  }
  0x80   :  { %351 = vmatprep.subr.bf16.mxu0 %v1568_v10  ;;  %583 = vmatpush1.bf16.msra.mxu1 %v1614_v29  ;;  %v1638_v58 = vld [vmem:[#allocation7 + $0xb0] ss:$8 sps:$4 sm:$0xff]   ;;  %v1639_v59 = vld [vmem:[#allocation7 + $0xc4] ss:$8 sps:$4 sm:$0xff]   ;;  %v1641_v60 = vld [vmem:[#allocation7 + $0xc0] ss:$8 sps:$4 sm:$0xff]  }
  0x81   :  { %584 = vmatprep.subr.bf16.mxu1 %v1615_v30  ;;  %v1642_v61 = vld [vmem:[#allocation7 + $0xd4] ss:$8 sps:$4 sm:$0xff]   ;;  %v1644_v62 = vld [vmem:[#allocation7 + $0xd0] ss:$8 sps:$4 sm:$0xff]   ;;  %v1645_v63 = vld [vmem:[#allocation7 + $0xe4] ss:$8 sps:$4 sm:$0xff]  }
  0x82   :  { %v1647_v0 = vld [vmem:[#allocation7 + $0xe0] ss:$8 sps:$4 sm:$0xff]   ;;  %v1648_v1 = vld [vmem:[#allocation7 + $0xf4] ss:$8 sps:$4 sm:$0xff]   ;;  %v1650_v2 = vld [vmem:[#allocation7 + $0xf0] ss:$8 sps:$4 sm:$0xff]  }
  0x83   :  { %352 = vmatpush1.bf16.msra.mxu0 %v1570_v11  ;;  %v1651_v3 = vld [vmem:[#allocation8] ss:$8 sps:$4 sm:$0xff]   ;;  %v1653_v4 = vld [vmem:[#allocation8 + $0x4] ss:$8 sps:$4 sm:$0xff]   ;;  %v1656_v5 = vld [vmem:[#allocation8 + $0x14] ss:$8 sps:$4 sm:$0xff]  }
  0x84   :  { %353 = vmatprep.subr.bf16.mxu0 %v1571_v12  ;;  %585 = vmatpush1.bf16.msra.mxu1 %v1617_v33  ;;  %v1654_v6 = vld [vmem:[#allocation8 + $0x10] ss:$8 sps:$4 sm:$0xff]   ;;  %v1659_v7 = vld [vmem:[#allocation8 + $0x24] ss:$8 sps:$4 sm:$0xff]   ;;  %v1657_v8 = vld [vmem:[#allocation8 + $0x20] ss:$8 sps:$4 sm:$0xff]  }
  0x85   :  { %586 = vmatprep.subr.bf16.mxu1 %v1618_v34  ;;  %v1662_v9 = vld [vmem:[#allocation8 + $0x34] ss:$8 sps:$4 sm:$0xff]   ;;  %v1660_v10 = vld [vmem:[#allocation8 + $0x30] ss:$8 sps:$4 sm:$0xff]   ;;  %v1665_v11 = vld [vmem:[#allocation8 + $0x44] ss:$8 sps:$4 sm:$0xff]  }
  0x86   :  { %v1663_v12 = vld [vmem:[#allocation8 + $0x40] ss:$8 sps:$4 sm:$0xff]   ;;  %v1666_v14 = vld [vmem:[#allocation8 + $0x50] ss:$8 sps:$4 sm:$0xff]   ;;  %v1671_v15 = vld [vmem:[#allocation8 + $0x64] ss:$8 sps:$4 sm:$0xff]  }
  0x87   :  { %354 = vmatpush1.bf16.msra.mxu0 %v1573_v13  ;;  %v1668_v13 = vld [vmem:[#allocation8 + $0x54] ss:$8 sps:$4 sm:$0xff]   ;;  %v1669_v16 = vld [vmem:[#allocation8 + $0x60] ss:$8 sps:$4 sm:$0xff]   ;;  %v1672_v18 = vld [vmem:[#allocation8 + $0x70] ss:$8 sps:$4 sm:$0xff]  }
  0x88   :  { %355 = vmatprep.subr.bf16.mxu0 %v1574_v19  ;;  %587 = vmatpush1.bf16.msra.mxu1 %v1620_v37  ;;  %v1674_v17 = vld [vmem:[#allocation8 + $0x74] ss:$8 sps:$4 sm:$0xff]   ;;  %v1677_v19 = vld [vmem:[#allocation8 + $0x84] ss:$8 sps:$4 sm:$0xff]   ;;  %v1678_v22 = vld [vmem:[#allocation8 + $0x90] ss:$8 sps:$4 sm:$0xff]  }
  0x89   :  { %588 = vmatprep.subr.bf16.mxu1 %v1621_v38  ;;  %v1680_v21 = vld [vmem:[#allocation8 + $0x94] ss:$8 sps:$4 sm:$0xff]   ;;  %v1684_v26 = vld [vmem:[#allocation8 + $0xb0] ss:$8 sps:$4 sm:$0xff]   ;;  %s1361_s17 = sshll.u32 %s1937_s16, 4  ;;  %s1362_s17 = int_to_ptr.vmem [resolvable:$true] %s1361_s17 }
  0x8a   :  { %v1686_v25 = vld [vmem:[#allocation8 + $0xb4] ss:$8 sps:$4 sm:$0xff]   ;;  %v1690_v30 = vld [vmem:[#allocation8 + $0xd0] ss:$8 sps:$4 sm:$0xff]   ;;  %s1895_s18 = scalar_lea.vmem %s1362_s17, 128  ;;  %p1900_p7 = scmp.lt.s32.totalorder %s1362_s17, %s1362_s17 }
  0x8b   :  { %356 = vmatpush1.bf16.msra.mxu0 %v1576_v20  ;;  %v1675_v20 = vld [vmem:[#allocation8 + $0x80] ss:$8 sps:$4 sm:$0xff]   ;;  %v1692_v29 = vld [vmem:[#allocation8 + $0xd4] ss:$8 sps:$4 sm:$0xff]   ;;  %v162_v34 = vld [vmem:[%s2159_s2] sm:$0x3]  ;;  %p1896_p6 = scmp.ne.s32.totalorder %s1362_s17, %s1895_s18  ;;  %p1901_p8 = scmp.lt.s32.totalorder %s1895_s18, %s1895_s18 }
  0x8c   :  { %357 = vmatprep.subr.bf16.mxu0 %v1577_v23  ;;  %589 = vmatpush1.bf16.msra.mxu1 %v1623_v40  ;;  %v1683_v23 = vld [vmem:[#allocation8 + $0xa4] ss:$8 sps:$4 sm:$0xff]  }
  0x8d   :  { %590 = vmatprep.subr.bf16.mxu1 %v1624_v42  ;;  %p1902_p9 = por %p1901_p8, %p1900_p7 }
  0x8f   :  { %358 = vmatpush1.bf16.msra.mxu0 %v1579_v24  ;;  %v1681_v24 = vld [vmem:[#allocation8 + $0xa0] ss:$8 sps:$4 sm:$0xff]   ;;  %p1903_p10 = pnand %p1902_p9, %p1896_p6 }
  0x90   :  { %359 = vmatprep.subr.bf16.mxu0 %v1580_v27  ;;  %591 = vmatpush1.bf16.msra.mxu1 %v1626_v44  ;;  %v1689_v27 = vld [vmem:[#allocation8 + $0xc4] ss:$8 sps:$4 sm:$0xff]  }
  0x91   :  { %592 = vmatprep.subr.bf16.mxu1 %v1627_v46  ;;  %v1695_v46 = vld [vmem:[#allocation8 + $0xe4] ss:$8 sps:$4 sm:$0xff]  }
  0x93   :  { %360 = vmatpush1.bf16.msra.mxu0 %v1582_v28  ;;  %v1687_v28 = vld [vmem:[#allocation8 + $0xc0] ss:$8 sps:$4 sm:$0xff]  }
  0x94   :  { %361 = vmatprep.subr.bf16.mxu0 %v1583_v31  ;;  %593 = vmatpush1.bf16.msra.mxu1 %v1629_v48  ;;  %v164_v31 = vlaneseq  ;;  %v1698_v48 = vld [vmem:[#allocation8 + $0xf4] ss:$8 sps:$4 sm:$0xff]  }
  0x95   :  { %594 = vmatprep.subr.bf16.mxu1 %v1630_v50  ;;  %v1699_v50 = vld [vmem:[#allocation10] ss:$8 sps:$4 sm:$0xff]  }
  0x97   :  { %362 = vmatpush1.bf16.msra.mxu0 %v1585_v32  ;;  %v165_v32 = vshrl.u32 %v164_v31, 7 }
  0x98   :  { %363 = vmatprep.subr.bf16.mxu0 %v1586_v35  ;;  %595 = vmatpush1.bf16.msra.mxu1 %v1632_v52  ;;  %v1704_v52 = vld [vmem:[#allocation10 + $0x14] ss:$8 sps:$4 sm:$0xff]  }
  0x99   :  { %596 = vmatprep.subr.bf16.mxu1 %v1633_v54  ;;  %v2103_v33 = vsub.s32 0, %v165_v32  ;;  %v2108_v35 = vsub.s32 1, %v165_v32  ;;  %v1707_v54 = vld [vmem:[#allocation10 + $0x24] ss:$8 sps:$4 sm:$0xff]  }
  0x9a   :  { %v1743_v32 = vld [vmem:[#allocation10 + $0xe4] ss:$8 sps:$4 sm:$0xff]  }
  0x9b   :  { %364 = vmatpush1.bf16.msra.mxu0 %v1588_v36  ;;  %v167_v36 = vrot.slane %v162_v34, %v2103_v33  ;;  %v171_v37 = vrot.slane %v162_v34, %v2108_v35  ;;  %v1741_v34 = vld [vmem:[#allocation10 + $0xe0] ss:$8 sps:$4 sm:$0xff]  }
  0x9c   :  { %365 = vmatprep.subr.bf16.mxu0 %v1589_v39  ;;  %597 = vmatpush1.bf16.msra.mxu1 %v1635_v55  ;;  %v1705_v55 = vld [vmem:[#allocation10 + $0x20] ss:$8 sps:$4 sm:$0xff]  }
  0x9d   :  { %598 = vmatprep.subr.bf16.mxu1 %v1636_v56  ;;  %v1710_v56 = vld [vmem:[#allocation10 + $0x34] ss:$8 sps:$4 sm:$0xff]  }
  0x9f   :  { %366 = vmatpush1.bf16.msra.mxu0 %v1591_v41 }
  0xa0   :  { %367 = vmatprep.subr.bf16.mxu0 %v1592_v43  ;;  %599 = vmatpush1.bf16.msra.mxu1 %v1638_v58  ;;  %v1713_v58 = vld [vmem:[#allocation10 + $0x44] ss:$8 sps:$4 sm:$0xff]  }
  0xa1   :  { %600 = vmatprep.subr.bf16.mxu1 %v1639_v59  ;;  %v1711_v59 = vld [vmem:[#allocation10 + $0x40] ss:$8 sps:$4 sm:$0xff]  }
  0xa3   :  { %368 = vmatpush1.bf16.msra.mxu0 %v1594_v45 }
  0xa4   :  { %369 = vmatprep.subr.bf16.mxu0 %v1595_v47  ;;  %601 = vmatpush1.bf16.msra.mxu1 %v1641_v60  ;;  %v1693_v47 = vld [vmem:[#allocation8 + $0xe0] ss:$8 sps:$4 sm:$0xff]   ;;  %v1716_v60 = vld [vmem:[#allocation10 + $0x54] ss:$8 sps:$4 sm:$0xff]  }
  0xa5   :  { %602 = vmatprep.subr.bf16.mxu1 %v1642_v61  ;;  %v1714_v61 = vld [vmem:[#allocation10 + $0x50] ss:$8 sps:$4 sm:$0xff]  }
  0xa7   :  { %370 = vmatpush1.bf16.msra.mxu0 %v1597_v49  ;;  %v1696_v49 = vld [vmem:[#allocation8 + $0xf0] ss:$8 sps:$4 sm:$0xff]  }
  0xa8   :  { %371 = vmatprep.subr.bf16.mxu0 %v1598_v51  ;;  %603 = vmatpush1.bf16.msra.mxu1 %v1644_v62  ;;  %v1701_v51 = vld [vmem:[#allocation10 + $0x4] ss:$8 sps:$4 sm:$0xff]  }
  0xa9   :  { %604 = vmatprep.subr.bf16.mxu1 %v1645_v63  ;;  %v1719_v62 = vld [vmem:[#allocation10 + $0x64] ss:$8 sps:$4 sm:$0xff]   ;;  %v1717_v63 = vld [vmem:[#allocation10 + $0x60] ss:$8 sps:$4 sm:$0xff]  }
  0xab   :  { %372 = vmatpush1.bf16.msra.mxu0 %v1600_v53  ;;  %v1702_v53 = vld [vmem:[#allocation10 + $0x10] ss:$8 sps:$4 sm:$0xff]  }
  0xac   :  { %605 = vmatpush1.bf16.msra.mxu1 %v1647_v0  ;;  %841 = vmatprep.subr.bf16.mxu0 %v1653_v4  ;;  %v1722_v0 = vld [vmem:[#allocation10 + $0x74] ss:$8 sps:$4 sm:$0xff]  }
  0xad   :  { %606 = vmatprep.subr.bf16.mxu1 %v1648_v1  ;;  %v1720_v1 = vld [vmem:[#allocation10 + $0x70] ss:$8 sps:$4 sm:$0xff]   ;;  %v1728_v4 = vld [vmem:[#allocation10 + $0x94] ss:$8 sps:$4 sm:$0xff]  }
  0xae   :  { %374 = vmatmul.mubr.bf16.vlgmr.msra.gmra.mrb[0].mxu0 %v1373_v57  ;;  %v1708_v57 = vld [vmem:[#allocation10 + $0x30] ss:$8 sps:$4 sm:$0xff]  }
  0xaf   :  { %842 = vmatpush1.bf16.msra.mxu0 %v1651_v3  ;;  %v1723_v3 = vld [vmem:[#allocation10 + $0x80] ss:$8 sps:$4 sm:$0xff]  }
  0xb0   :  { %607 = vmatpush1.bf16.msra.mxu1 %v1650_v2  ;;  %843 = vmatprep.subr.bf16.mxu0 %v1656_v5  ;;  %v1725_v2 = vld [vmem:[#allocation10 + $0x84] ss:$8 sps:$4 sm:$0xff]   ;;  %v1726_v5 = vld [vmem:[#allocation10 + $0x90] ss:$8 sps:$4 sm:$0xff]  }
  0xb1   :  { %1106 = vmatprep.subr.bf16.mxu1 %v1701_v51 }
  0xb3   :  { %844 = vmatpush1.bf16.msra.mxu0 %v1654_v6  ;;  %v1731_v6 = vld [vmem:[#allocation10 + $0xa4] ss:$8 sps:$4 sm:$0xff]  }
  0xb4   :  { %845 = vmatprep.subr.bf16.mxu0 %v1659_v7  ;;  %v1729_v7 = vld [vmem:[#allocation10 + $0xa0] ss:$8 sps:$4 sm:$0xff]  }
  0xb7   :  { %846 = vmatpush1.bf16.msra.mxu0 %v1657_v8  ;;  %v1734_v8 = vld [vmem:[#allocation10 + $0xb4] ss:$8 sps:$4 sm:$0xff]  }
  0xb8   :  { %847 = vmatprep.subr.bf16.mxu0 %v1662_v9  ;;  %v1732_v9 = vld [vmem:[#allocation10 + $0xb0] ss:$8 sps:$4 sm:$0xff]  }
  0xbb   :  { %848 = vmatpush1.bf16.msra.mxu0 %v1660_v10  ;;  %v1737_v10 = vld [vmem:[#allocation10 + $0xc4] ss:$8 sps:$4 sm:$0xff]  }
  0xbc   :  { %849 = vmatprep.subr.bf16.mxu0 %v1665_v11  ;;  %v1735_v11 = vld [vmem:[#allocation10 + $0xc0] ss:$8 sps:$4 sm:$0xff]  }
  0xbf   :  { %850 = vmatpush1.bf16.msra.mxu0 %v1663_v12  ;;  %v1740_v12 = vld [vmem:[#allocation10 + $0xd4] ss:$8 sps:$4 sm:$0xff]  }
  0xc0   :  { %851 = vmatprep.subr.bf16.mxu0 %v1668_v13  ;;  %v1738_v13 = vld [vmem:[#allocation10 + $0xd0] ss:$8 sps:$4 sm:$0xff]  }
  0xc3   :  { %852 = vmatpush1.bf16.msra.mxu0 %v1666_v14  ;;  %v617_v14 = vld [vmem:[%s2161_s4] sm:$0x3] }
  0xc4   :  { %853 = vmatprep.subr.bf16.mxu0 %v1671_v15  ;;  %v631_v15 = vld [vmem:[%s2162_s5] sm:$0x3] }
  0xc7   :  { %854 = vmatpush1.bf16.msra.mxu0 %v1669_v16  ;;  %v622_v16 = vrot.slane %v617_v14, %v2103_v33 }
  0xc8   :  { %855 = vmatprep.subr.bf16.mxu0 %v1674_v17  ;;  %v626_v17 = vrot.slane %v617_v14, %v2108_v35 }
  0xcb   :  { %856 = vmatpush1.bf16.msra.mxu0 %v1672_v18  ;;  %v636_v18 = vrot.slane %v631_v15, %v2103_v33 }
  0xcc   :  { %857 = vmatprep.subr.bf16.mxu0 %v1677_v19 }
  0xcf   :  { %858 = vmatpush1.bf16.msra.mxu0 %v1675_v20  ;;  %v640_v20 = vrot.slane %v631_v15, %v2108_v35 }
  0xd0   :  { %859 = vmatprep.subr.bf16.mxu0 %v1680_v21 }
  0xd3   :  { %860 = vmatpush1.bf16.msra.mxu0 %v1678_v22 }
  0xd4   :  { %861 = vmatprep.subr.bf16.mxu0 %v1683_v23 }
  0xd7   :  { %862 = vmatpush1.bf16.msra.mxu0 %v1681_v24 }
  0xd8   :  { %863 = vmatprep.subr.bf16.mxu0 %v1686_v25 }
  0xdb   :  { %864 = vmatpush1.bf16.msra.mxu0 %v1684_v26 }
  0xdc   :  { %865 = vmatprep.subr.bf16.mxu0 %v1689_v27 }
  0xdf   :  { %866 = vmatpush1.bf16.msra.mxu0 %v1687_v28 }
  0xe0   :  { %867 = vmatprep.subr.bf16.mxu0 %v1692_v29 }
  0xe3   :  { %868 = vmatpush1.bf16.msra.mxu0 %v1690_v30 }
  0xe4   :  { %869 = vmatprep.subr.bf16.mxu0 %v1695_v46  ;;  %v1755_v46 = vld [vmem:[#allocation11 + $0x60] sm:$0xff]  }
  0xe7   :  { %870 = vmatpush1.bf16.msra.mxu0 %v1693_v47  ;;  %v1756_v47 = vld [vmem:[#allocation11 + $0x20] sm:$0xff]  }
  0xe8   :  { %871 = vmatprep.subr.bf16.mxu0 %v1698_v48  ;;  %v1757_v48 = vld [vmem:[#allocation11 + $0x68] sm:$0xff]  }
  0xeb   :  { %872 = vmatpush1.bf16.msra.mxu0 %v1696_v49  ;;  %v882_v49 = vld [vmem:[%s2164_s7] sm:$0x3] }
  0xec   :  { %v887_v51 = vrot.slane %v882_v49, %v2103_v33 }
 0x181   :  { %v375_v38 = vpop.f32.mrb[0].mxu0 }
 0x182   :  { %v376_v39 = vadd.f32 %v375_v38, %v167_v36  ;;  %v377_v40 = vpop.f32.mrb[1].mxu0  ;;  %v1746_v36 = vld [vmem:[#allocation10 + $0xf4] ss:$8 sps:$4 sm:$0xff]   ;;  %v1747_v38 = vld [vmem:[#allocation11 + $0x40] sm:$0xff]  }
 0x183   :  { %v379_v41 = vpop.f32.mrb[2].mxu0  ;;  %v378_v42 = vadd.f32 %v377_v40, %v171_v37  ;;  %v1744_v37 = vld [vmem:[#allocation10 + $0xf0] ss:$8 sps:$4 sm:$0xff]   ;;  %v1749_v40 = vld [vmem:[#allocation11 + $0x48] sm:$0xff]   ;;  %1520 = vmatprep.subr.bf16.mxu0 %v1747_v38 }
 0x184   :  { %v380_v43 = vpop.f32.mrb[3].mxu0  ;;  %v382_v45 = vpack.c.bf16 %v376_v39, %v376_v39  ;;  %v1748_v39 = vld [vmem:[#allocation11] sm:$0xff]   ;;  %v1750_v41 = vld [vmem:[#allocation11 + $0x8] sm:$0xff]  }
 0x185   :  { %v383_v44 = vpack.c.bf16 %v378_v42, %v378_v42  ;;  %v1751_v42 = vld [vmem:[#allocation11 + $0x50] sm:$0xff]  }
 0x186   :  { %v1752_v43 = vld [vmem:[#allocation11 + $0x10] sm:$0xff]  }
 0x187   :  { %608 = vmatprep.mubr.bf16.mxu1 %v383_v44  ;;  %v1753_v44 = vld [vmem:[#allocation11 + $0x58] sm:$0xff]  }
 0x188   :  { %609 = vmatmul.mubr.bf16.vlgmr.msra.gmra.mrb[0].mxu1 %v382_v45  ;;  %v1754_v45 = vld [vmem:[#allocation11 + $0x18] sm:$0xff]  }
 0x189   :  { %1107 = vmatpush1.bf16.msra.mxu1 %v1699_v50  ;;  %v896_v50 = vld [vmem:[%s2165_s8] sm:$0x3] }
 0x18a   :  { %1108 = vmatprep.subr.bf16.mxu1 %v1704_v52  ;;  %v891_v52 = vrot.slane %v882_v49, %v2108_v35 }
 0x18d   :  { %1109 = vmatpush1.bf16.msra.mxu1 %v1702_v53  ;;  %v901_v53 = vrot.slane %v896_v50, %v2103_v33 }
 0x18e   :  { %1110 = vmatprep.subr.bf16.mxu1 %v1707_v54 }
 0x191   :  { %1111 = vmatpush1.bf16.msra.mxu1 %v1705_v55  ;;  %v905_v55 = vrot.slane %v896_v50, %v2108_v35 }
 0x192   :  { %1112 = vmatprep.subr.bf16.mxu1 %v1710_v56 }
 0x195   :  { %1113 = vmatpush1.bf16.msra.mxu1 %v1708_v57 }
 0x196   :  { %1114 = vmatprep.subr.bf16.mxu1 %v1713_v58 }
 0x199   :  { %1115 = vmatpush1.bf16.msra.mxu1 %v1711_v59 }
 0x19a   :  { %1116 = vmatprep.subr.bf16.mxu1 %v1716_v60 }
 0x19d   :  { %1117 = vmatpush1.bf16.msra.mxu1 %v1714_v61 }
 0x19e   :  { %1118 = vmatprep.subr.bf16.mxu1 %v1719_v62 }
 0x1a1   :  { %1119 = vmatpush1.bf16.msra.mxu1 %v1717_v63 }
 0x1a2   :  { %1120 = vmatprep.subr.bf16.mxu1 %v1722_v0 }
 0x1a5   :  { %1121 = vmatpush1.bf16.msra.mxu1 %v1720_v1 }
 0x1a6   :  { %1122 = vmatprep.subr.bf16.mxu1 %v1725_v2 }
 0x1a9   :  { %1123 = vmatpush1.bf16.msra.mxu1 %v1723_v3  ;;  %v1758_v3 = vld [vmem:[#allocation11 + $0x28] sm:$0xff]  }
 0x1aa   :  { %1124 = vmatprep.subr.bf16.mxu1 %v1728_v4  ;;  %v1759_v4 = vld [vmem:[#allocation11 + $0x70] sm:$0xff]  }
 0x1ad   :  { %1125 = vmatpush1.bf16.msra.mxu1 %v1726_v5  ;;  %v1760_v5 = vld [vmem:[#allocation11 + $0x30] sm:$0xff]  }
 0x1ae   :  { %1126 = vmatprep.subr.bf16.mxu1 %v1731_v6  ;;  %v1761_v6 = vld [vmem:[#allocation11 + $0x78] sm:$0xff]  }
 0x1b1   :  { %1127 = vmatpush1.bf16.msra.mxu1 %v1729_v7  ;;  %v1762_v7 = vld [vmem:[#allocation11 + $0x38] sm:$0xff]  }
 0x1b2   :  { %1128 = vmatprep.subr.bf16.mxu1 %v1734_v8  ;;  %v1147_v8 = vld [vmem:[%s2167_s10] sm:$0x3] }
 0x1b5   :  { %1129 = vmatpush1.bf16.msra.mxu1 %v1732_v9  ;;  %v1161_v9 = vld [vmem:[%s2168_s11] sm:$0x3] }
 0x1b6   :  { %1130 = vmatprep.subr.bf16.mxu1 %v1737_v10  ;;  %v1152_v10 = vrot.slane %v1147_v8, %v2103_v33  ;;  %v1170_v14 = vrot.slane %v1161_v9, %v2108_v35 }
 0x1b9   :  { %1131 = vmatpush1.bf16.msra.mxu1 %v1735_v11  ;;  %v1156_v11 = vrot.slane %v1147_v8, %v2108_v35 }
 0x1ba   :  { %1132 = vmatprep.subr.bf16.mxu1 %v1740_v12  ;;  %v1166_v12 = vrot.slane %v1161_v9, %v2103_v33  ;;  %v1503_v33 = vld [vmem:[%s2170_s13] ss:$0 sm:$0xff] }
 0x1bd   :  { %1133 = vmatpush1.bf16.msra.mxu1 %v1738_v13 }
 0x1be   :  { %1134 = vmatprep.subr.bf16.mxu1 %v1743_v32 }
 0x1c1   :  { %1135 = vmatpush1.bf16.msra.mxu1 %v1741_v34 }
 0x1c2   :  { %1136 = vmatprep.subr.bf16.mxu1 %v1746_v36 }
 0x1c5   :  { %1137 = vmatpush1.bf16.msra.mxu1 %v1744_v37 }
 0x25b   :  { %v610_v19 = vpop.f32.mrb[0].mxu1 }
 0x25c   :  { %v629_v21 = vmul.f32 %v622_v16, %v610_v19  ;;  %v612_v22 = vpop.f32.mrb[1].mxu1 }
 0x25d   :  { %v630_v23 = vmul.f32 %v626_v17, %v612_v22  ;;  %v614_v24 = vpop.f32.mrb[2].mxu1 }
 0x25e   :  { %v643_v25 = vadd.f32 %v636_v18, %v629_v21  ;;  %v615_v26 = vpop.f32.mrb[3].mxu1 }
 0x25f   :  { %v644_v27 = vadd.f32 %v640_v20, %v630_v23 }
 0x260   :  { %v645_v28 = vmax.f32 %v643_v25, 0.0 }
 0x261   :  { %v646_v29 = vmax.f32 %v644_v27, 0.0 }
 0x262   :  { %v647_v31 = vpack.c.bf16 %v645_v28, %v645_v28 }
 0x263   :  { %v648_v30 = vpack.c.bf16 %v646_v29, %v646_v29 }
 0x265   :  { %873 = vmatprep.mubr.bf16.mxu0 %v648_v30 }
 0x266   :  { %874 = vmatmul.mubr.bf16.vlgmr.msra.gmra.mrb[4].mxu0 %v647_v31 }
 0x267   :  { %1521 = vmatpush3.bf16.msra.mxu0 %v1748_v39 }
 0x268   :  { %1522 = vmatprep.subr.bf16.mxu0 %v1749_v40 }
 0x26b   :  { %1523 = vmatpush3.bf16.msra.mxu0 %v1750_v41 }
 0x26c   :  { %1524 = vmatprep.subr.bf16.mxu0 %v1751_v42 }
 0x26f   :  { %1525 = vmatpush3.bf16.msra.mxu0 %v1752_v43 }
 0x270   :  { %1526 = vmatprep.subr.bf16.mxu0 %v1753_v44 }
 0x273   :  { %1527 = vmatpush3.bf16.msra.mxu0 %v1754_v45 }
 0x274   :  { %1528 = vmatprep.subr.bf16.mxu0 %v1755_v46 }
 0x277   :  { %1529 = vmatpush3.bf16.msra.mxu0 %v1756_v47 }
 0x278   :  { %1530 = vmatprep.subr.bf16.mxu0 %v1757_v48 }
 0x27b   :  { %1531 = vmatpush3.bf16.msra.mxu0 %v1758_v3 }
 0x27c   :  { %1532 = vmatprep.subr.bf16.mxu0 %v1759_v4 }
 0x27f   :  { %1533 = vmatpush3.bf16.msra.mxu0 %v1760_v5 }
 0x280   :  { %1534 = vmatprep.subr.bf16.mxu0 %v1761_v6 }
 0x283   :  { %1535 = vmatpush3.bf16.msra.mxu0 %v1762_v7 }
 0x339   :  { %v875_v54 = vpop.f32.mrb[4].mxu0 }
 0x33a   :  { %v894_v56 = vmul.f32 %v887_v51, %v875_v54  ;;  %v877_v57 = vpop.f32.mrb[5].mxu0 }
 0x33b   :  { %v895_v58 = vmul.f32 %v891_v52, %v877_v57  ;;  %v879_v59 = vpop.f32.mrb[6].mxu0 }
 0x33c   :  { %v908_v60 = vadd.f32 %v901_v53, %v894_v56  ;;  %v880_v61 = vpop.f32.mrb[7].mxu0 }
 0x33d   :  { %v909_v62 = vadd.f32 %v905_v55, %v895_v58 }
 0x33e   :  { %v910_v63 = vmax.f32 %v908_v60, 0.0 }
 0x33f   :  { %v911_v0 = vmax.f32 %v909_v62, 0.0 }
 0x340   :  { %v912_v2 = vpack.c.bf16 %v910_v63, %v910_v63 }
 0x341   :  { %v913_v1 = vpack.c.bf16 %v911_v0, %v911_v0 }
 0x343   :  { %1138 = vmatprep.mubr.bf16.mxu1 %v913_v1 }
 0x344   :  { %1139 = vmatmul.mubr.bf16.vlgmr.msra.gmra.mrb[4].mxu1 %v912_v2 }
 0x417   :  { %v1140_v13 = vpop.f32.mrb[4].mxu1 }
 0x418   :  { %v1159_v15 = vmul.f32 %v1152_v10, %v1140_v13  ;;  %v1142_v16 = vpop.f32.mrb[5].mxu1 }
 0x419   :  { %v1160_v17 = vmul.f32 %v1156_v11, %v1142_v16  ;;  %v1144_v18 = vpop.f32.mrb[6].mxu1 }
 0x41a   :  { %v1173_v19 = vadd.f32 %v1166_v12, %v1159_v15  ;;  %v1145_v20 = vpop.f32.mrb[7].mxu1 }
 0x41b   :  { %v1174_v21 = vadd.f32 %v1170_v14, %v1160_v17 }
 0x41c   :  { %v1175_v22 = vmax.f32 %v1173_v19, 0.0 }
 0x41d   :  { %v1176_v23 = vmax.f32 %v1174_v21, 0.0 }
 0x41e   :  { %v1177_v25 = vpack.c.bf16 %v1175_v22, %v1175_v22 }
 0x41f   :  { %v1178_v24 = vpack.c.bf16 %v1176_v23, %v1176_v23 }
 0x421   :  { %1346 = vmatprep.mubr.bf16.mxu0 %v1178_v24 }
 0x422   :  { %1347 = vmatmul.mubr.bf16.vlgmr.msra.gmra.mrb[8].mxu0 %v1177_v25 }
 0x4f5   :  { %v1536_v26 = vpop.f32.mrb[8].mxu0 }
 0x4f6   :  { %v1537_v27 = vpop.f32.mrb[9].mxu0 }
 0x4f7   :  { %v1538_v35 = vadd.f32 %v1537_v27, %v1536_v26  ;;  %v1539_v28 = vpop.f32.mrb[10].mxu0 }
 0x4f8   :  { %v1540_v29 = vpop.f32.mrb[11].mxu0 }
 0x4f9   :  { %v1349_v30 = vadd.f32 %v1538_v35, %v1503_v33 }
 0x4fb   :  { %1354 = vst [vmem:[#allocation13] sm:$0xff] %v1349_v30 }
 0x4fc   :  { %1906 = shalt.err (!%p1903_p10)
}
 0x4fd   :  { %s1907_s13 = scalar_lea.hbm %s2171_s14, 128 }
 0x4fe   :  { %p1908_p11 = scmp.ne.s32.totalorder %s2171_s14, %s1907_s13  ;;  %p1911_p12 = scmp.lt.u32.totalorder %s1907_s13, %s2171_s14 }
 0x500   :  { %p1913_p13 = pnand %p1911_p12, %p1908_p11 }
 0x502   :  { %1916 = shalt.err (!%p1913_p13)
}
 0x503   :  { %1364 = dma.vmem_to_hbm [thread:$0]  %s1362_s17, 128, %s2171_s14, [#allocation4]  }
 0x504   :  { %1925 = dma.done.wait [#allocation4], 128  }
 0x505   :  { %1926 = vsyncadd [#allocation4], 4294967168 }
 0x506   :  { %1368 = vsyncpa [#allocation3], 1 }
 0x507   :  { %1369 = vsyncpa [#allocation6], 1 }
 0x508   :  { %1370 = vsyncpa [#allocation9], 1 }
 0x509   :  { %1371 = vsyncpa [#allocation12], 1 }
 0x50a   :  { %1372 = vsyncpa [#allocation4], 1 }

// kernel: tpu_custom_call.1
= control target key start
LH: loop header
LB: loop body
LE: loop exit
PB: predicated region body
PF: predicated region fallthrough
CT: control target
= control target key end

     0   :  { %19 = vsyncpa [#allocation3], 0  ;;  %s2157_s0 = inlined_call_operand.hbm [shape: bf16[8,256], index: 0, kind: input, shape index: {}]   ;;  %s2158_s1 = inlined_call_operand.hbm [shape: bf16[256,256], index: 1, kind: input, shape index: {}]   ;;  %s2159_s2 = inlined_call_operand.vmem [shape: f32[1,256], index: 2, kind: input, shape index: {}]   ;;  %s2160_s3 = inlined_call_operand.hbm [shape: bf16[256,256], index: 3, kind: input, shape index: {}]   ;;  %s2161_s4 = inlined_call_operand.vmem [shape: f32[1,256], index: 4, kind: input, shape index: {}]   ;;  %s2162_s5 = inlined_call_operand.vmem [shape: f32[1,256], index: 5, kind: input, shape index: {}]   ;;  %s2163_s6 = inlined_call_operand.hbm [shape: bf16[256,256], index: 6, kind: input, shape index: {}]   ;;  %s2164_s7 = inlined_call_operand.vmem [shape: f32[1,256], index: 7, kind: input, shape index: {}]   ;;  %s2165_s8 = inlined_call_operand.vmem [shape: f32[1,256], index: 8, kind: input, shape index: {}]   ;;  %s2166_s9 = inlined_call_operand.hbm [shape: bf16[256,256], index: 9, kind: input, shape index: {}]   ;;  %s2167_s10 = inlined_call_operand.vmem [shape: f32[1,256], index: 10, kind: input, shape index: {}]   ;;  %s2168_s11 = inlined_call_operand.vmem [shape: f32[1,256], index: 11, kind: input, shape index: {}]   ;;  %s2169_s12 = inlined_call_operand.hbm [shape: bf16[256,128], index: 12, kind: input, shape index: {}]   ;;  %s2170_s13 = inlined_call_operand.vmem [shape: f32[1,128], index: 13, kind: input, shape index: {}]   ;;  %s2171_s14 = inlined_call_operand.hbm [shape: f32[8,128], index: 14, kind: output, shape index: {}]  }
   0x1   :  { %20 = vsyncpa [#allocation6], 0 }
   0x2   :  { %21 = vsyncpa [#allocation9], 0 }
   0x3   :  { %22 = vsyncpa [#allocation12], 0 }
   0x4   :  { %23 = vsyncpa [#allocation4], 0  ;;  %s1927_s29 = smov [#allocation5]   ;;  %s1763_s17 = scalar_lea.hbm %s2158_s1, 4096 }
   0x5   :  { %s39_s30 = sshll.u32 %s1927_s29, 4  ;;  %p1764_p0 = scmp.ne.s32.totalorder %s2158_s1, %s1763_s17  ;;  %s40_s30 = int_to_ptr.vmem [resolvable:$true] %s39_s30 }
   0x6   :  { %p1767_p1 = scmp.lt.u32.totalorder %s1763_s17, %s2158_s1 }
   0x8   :  { %p1769_p2 = pnand %p1767_p1, %p1764_p0 }
   0xa   :  { %1772 = shalt.err (!%p1769_p2)
}
   0xb   :  { %s1773_s22 = scalar_lea.vmem %s40_s30, 4096  ;;  %p1778_p4 = scmp.lt.s32.totalorder %s40_s30, %s40_s30 }
   0xc   :  { %p1774_p3 = scmp.ne.s32.totalorder %s40_s30, %s1773_s22  ;;  %p1779_p5 = scmp.lt.s32.totalorder %s1773_s22, %s1773_s22 }
   0xe   :  { %p1780_p6 = por %p1779_p5, %p1778_p4 }
  0x10   :  { %p1781_p7 = pnand %p1780_p6, %p1774_p3 }
  0x12   :  { %1784 = shalt.err (!%p1781_p7)
}
  0x13   :  { %s1928_s23 = smov 128   ;;  %s1929_s24 = smov 8  }
  0x14   :  { %45 = dma.hbm_to_vmem [thread:$0]  %s2158_s1, 4096, %s40_s30, [#allocation6], %s1928_s23, %s1928_s23, %s1929_s24  }
  0x15   :  { %s1930_s27 = smov [#allocation8]   ;;  %s1931_s29 = smov [#allocation2]  }
  0x16   :  { %s69_s28 = sshll.u32 %s1930_s27, 4  ;;  %s30_s15 = sshll.u32 %s1931_s29, 4  ;;  %s70_s28 = int_to_ptr.vmem [resolvable:$true] %s69_s28  ;;  %s31_s15 = int_to_ptr.vmem [resolvable:$true] %s30_s15 }
  0x17   :  { %s1785_s18 = scalar_lea.hbm %s2163_s6, 4096 }
  0x18   :  { %p1786_p8 = scmp.ne.s32.totalorder %s2163_s6, %s1785_s18  ;;  %p1789_p9 = scmp.lt.u32.totalorder %s1785_s18, %s2163_s6 }
  0x1a   :  { %p1791_p10 = pnand %p1789_p9, %p1786_p8 }
  0x1c   :  { %1794 = shalt.err (!%p1791_p10)
}
  0x1d   :  { %s1795_s1 = scalar_lea.vmem %s70_s28, 4096  ;;  %p1800_p12 = scmp.lt.s32.totalorder %s70_s28, %s70_s28 }
  0x1e   :  { %p1796_p11 = scmp.ne.s32.totalorder %s70_s28, %s1795_s1  ;;  %p1801_p13 = scmp.lt.s32.totalorder %s1795_s1, %s1795_s1 }
  0x20   :  { %p1802_p0 = por %p1801_p13, %p1800_p12 }
  0x22   :  { %p1803_p1 = pnand %p1802_p0, %p1796_p11 }
  0x24   :  { %1806 = shalt.err (!%p1803_p1)
}
  0x25   :  { %75 = dma.hbm_to_vmem [thread:$0]  %s2163_s6, 4096, %s70_s28, [#allocation9], %s1928_s23, %s1928_s23, %s1929_s24  }
  0x26   :  { %s1807_s29 = scalar_lea.hbm %s2157_s0, 128 }
  0x27   :  { %p1808_p2 = scmp.ne.s32.totalorder %s2157_s0, %s1807_s29  ;;  %p1811_p3 = scmp.lt.u32.totalorder %s1807_s29, %s2157_s0 }
  0x29   :  { %p1813_p4 = pnand %p1811_p3, %p1808_p2 }
  0x2b   :  { %1816 = shalt.err (!%p1813_p4)
}
  0x2c   :  { %s1817_s20 = scalar_lea.vmem %s31_s15, 128  ;;  %p1822_p6 = scmp.lt.s32.totalorder %s31_s15, %s31_s15 }
  0x2d   :  { %p1818_p5 = scmp.ne.s32.totalorder %s31_s15, %s1817_s20  ;;  %p1823_p7 = scmp.lt.s32.totalorder %s1817_s20, %s1817_s20 }
  0x2f   :  { %p1824_p8 = por %p1823_p7, %p1822_p6 }
  0x31   :  { %p1825_p9 = pnand %p1824_p8, %p1818_p5 }
  0x33   :  { %1828 = shalt.err (!%p1825_p9)
}
  0x34   :  { %33 = dma.hbm_to_vmem [thread:$0]  %s2157_s0, 128, %s31_s15, [#allocation3]  }
  0x35   :  { %s1932_s21 = smov [#allocation7]   ;;  %s1933_s1 = smov [#allocation10]  }
  0x36   :  { %s53_s22 = sshll.u32 %s1932_s21, 4  ;;  %s85_s30 = sshll.u32 %s1933_s1, 4  ;;  %s54_s22 = int_to_ptr.vmem [resolvable:$true] %s53_s22  ;;  %s86_s30 = int_to_ptr.vmem [resolvable:$true] %s85_s30 }
  0x37   :  { %s1829_s27 = scalar_lea.hbm %s2160_s3, 4096 }
  0x38   :  { %p1830_p10 = scmp.ne.s32.totalorder %s2160_s3, %s1829_s27  ;;  %p1833_p11 = scmp.lt.u32.totalorder %s1829_s27, %s2160_s3 }
  0x3a   :  { %p1835_p12 = pnand %p1833_p11, %p1830_p10 }
  0x3c   :  { %1838 = shalt.err (!%p1835_p12)
}
  0x3d   :  { %s1839_s0 = scalar_lea.vmem %s54_s22, 4096  ;;  %p1844_p0 = scmp.lt.s32.totalorder %s54_s22, %s54_s22 }
  0x3e   :  { %p1840_p13 = scmp.ne.s32.totalorder %s54_s22, %s1839_s0  ;;  %p1845_p1 = scmp.lt.s32.totalorder %s1839_s0, %s1839_s0 }
  0x40   :  { %p1846_p2 = por %p1845_p1, %p1844_p0 }
  0x42   :  { %p1847_p3 = pnand %p1846_p2, %p1840_p13 }
  0x44   :  { %1850 = shalt.err (!%p1847_p3)
}
  0x45   :  { %59 = dma.hbm_to_vmem [thread:$0]  %s2160_s3, 4096, %s54_s22, [#allocation6], %s1928_s23, %s1928_s23, %s1929_s24  }
  0x46   :  { %s1851_s28 = scalar_lea.hbm %s2166_s9, 4096 }
  0x47   :  { %p1852_p4 = scmp.ne.s32.totalorder %s2166_s9, %s1851_s28  ;;  %p1855_p5 = scmp.lt.u32.totalorder %s1851_s28, %s2166_s9 }
  0x49   :  { %p1857_p6 = pnand %p1855_p5, %p1852_p4 }
  0x4b   :  { %1860 = shalt.err (!%p1857_p6)
}
  0x4c   :  { %s1861_s27 = scalar_lea.vmem %s86_s30, 4096  ;;  %p1866_p8 = scmp.lt.s32.totalorder %s86_s30, %s86_s30 }
  0x4d   :  { %p1862_p7 = scmp.ne.s32.totalorder %s86_s30, %s1861_s27  ;;  %p1867_p9 = scmp.lt.s32.totalorder %s1861_s27, %s1861_s27 }
  0x4f   :  { %p1868_p10 = por %p1867_p9, %p1866_p8 }
  0x51   :  { %p1869_p11 = pnand %p1868_p10, %p1862_p7 }
  0x53   :  { %1872 = shalt.err (!%p1869_p11)
}
  0x54   :  { %91 = dma.hbm_to_vmem [thread:$0]  %s2166_s9, 4096, %s86_s30, [#allocation9], %s1928_s23, %s1928_s23, %s1929_s24  }
  0x55   :  { %s1934_s29 = smov [#allocation11]   ;;  %s1873_s0 = scalar_lea.hbm %s2169_s12, 2048 }
  0x56   :  { %s101_s16 = sshll.u32 %s1934_s29, 4  ;;  %p1874_p12 = scmp.ne.s32.totalorder %s2169_s12, %s1873_s0  ;;  %s102_s16 = int_to_ptr.vmem [resolvable:$true] %s101_s16 }
  0x57   :  { %p1877_p13 = scmp.lt.u32.totalorder %s1873_s0, %s2169_s12 }
  0x59   :  { %p1879_p0 = pnand %p1877_p13, %p1874_p12 }
  0x5b   :  { %1882 = shalt.err (!%p1879_p0)
}
  0x5c   :  { %s1883_s28 = scalar_lea.vmem %s102_s16, 2048  ;;  %p1888_p2 = scmp.lt.s32.totalorder %s102_s16, %s102_s16 }
  0x5d   :  { %p1884_p1 = scmp.ne.s32.totalorder %s102_s16, %s1883_s28  ;;  %p1889_p3 = scmp.lt.s32.totalorder %s1883_s28, %s1883_s28 }
  0x5f   :  { %p1890_p4 = por %p1889_p3, %p1888_p2 }
  0x61   :  { %p1891_p5 = pnand %p1890_p4, %p1884_p1 }
  0x63   :  { %1894 = shalt.err (!%p1891_p5)
}
  0x64   :  { %s1935_s9 = smov 64   ;;  %s1936_s23 = smov 4  }
  0x65   :  { %107 = dma.hbm_to_vmem [thread:$0]  %s2169_s12, 2048, %s102_s16, [#allocation12], %s1935_s9, %s1935_s9, %s1936_s23  }
  0x66   :  { %1917 = dma.done.wait [#allocation3], 128  }
  0x67   :  { %1918 = vsyncadd [#allocation3], 4294967168 }
  0x68   :  { %1919 = dma.done.wait [#allocation6], 8192  }
  0x69   :  { %1920 = vsyncadd [#allocation6], 4294959104 }
  0x6a   :  { %1921 = dma.done.wait [#allocation9], 8192  }
  0x6b   :  { %1922 = vsyncadd [#allocation9], 4294959104 }
  0x6c   :  { %1923 = dma.done.wait [#allocation12], 2048  }
  0x6d   :  { %1924 = vsyncadd [#allocation12], 4294965248  ;;  %v1553_v0 = vld [vmem:[#allocation5 + $0x4] ss:$8 sps:$4 sm:$0xff]   ;;  %v1555_v1 = vld [vmem:[#allocation5] ss:$8 sps:$4 sm:$0xff]  }
  0x6e   :  { %341 = vmatprep.subr.bf16.mxu0 %v1553_v0  ;;  %v1556_v2 = vld [vmem:[#allocation5 + $0x14] ss:$8 sps:$4 sm:$0xff]   ;;  %v1558_v3 = vld [vmem:[#allocation5 + $0x10] ss:$8 sps:$4 sm:$0xff]   ;;  %v1559_v4 = vld [vmem:[#allocation5 + $0x24] ss:$8 sps:$4 sm:$0xff]  }
  0x6f   :  { %342 = vmatpush1.bf16.msra.mxu0 %v1555_v1  ;;  %v1561_v5 = vld [vmem:[#allocation5 + $0x20] ss:$8 sps:$4 sm:$0xff]   ;;  %v1562_v6 = vld [vmem:[#allocation5 + $0x34] ss:$8 sps:$4 sm:$0xff]   ;;  %v1564_v7 = vld [vmem:[#allocation5 + $0x30] ss:$8 sps:$4 sm:$0xff]  }
  0x70   :  { %343 = vmatprep.subr.bf16.mxu0 %v1556_v2  ;;  %v1565_v8 = vld [vmem:[#allocation5 + $0x44] ss:$8 sps:$4 sm:$0xff]   ;;  %v1567_v9 = vld [vmem:[#allocation5 + $0x40] ss:$8 sps:$4 sm:$0xff]   ;;  %v1568_v10 = vld [vmem:[#allocation5 + $0x54] ss:$8 sps:$4 sm:$0xff]  }
  0x71   :  { %v1570_v11 = vld [vmem:[#allocation5 + $0x50] ss:$8 sps:$4 sm:$0xff]   ;;  %v1571_v12 = vld [vmem:[#allocation5 + $0x64] ss:$8 sps:$4 sm:$0xff]   ;;  %v1573_v13 = vld [vmem:[#allocation5 + $0x60] ss:$8 sps:$4 sm:$0xff]  }
  0x72   :  { %v2097_v14 = vld [vmem:[#allocation2] sm:$0xff]  ;;  %v1603_v16 = vld [vmem:[#allocation7 + $0x4] ss:$8 sps:$4 sm:$0xff]   ;;  %v1605_v17 = vld [vmem:[#allocation7] ss:$8 sps:$4 sm:$0xff]   ;;  %s1937_s16 = smov [#allocation13]  }
  0x73   :  { %344 = vmatpush1.bf16.msra.mxu0 %v1558_v3  ;;  %v1374_v15 = vcombine.high %v2097_v14, %v2097_v14  ;;  %v1606_v18 = vld [vmem:[#allocation7 + $0x14] ss:$8 sps:$4 sm:$0xff]   ;;  %576 = vmatprep.subr.bf16.mxu1 %v1603_v16  ;;  %v1576_v20 = vld [vmem:[#allocation5 + $0x70] ss:$8 sps:$4 sm:$0xff]   ;;  %v1609_v22 = vld [vmem:[#allocation7 + $0x24] ss:$8 sps:$4 sm:$0xff]   ;;  %v1373_v57 = vcombine.low %v2097_v14, %v2097_v14 }
  0x74   :  { %345 = vmatprep.subr.bf16.mxu0 %v1559_v4  ;;  %v1574_v19 = vld [vmem:[#allocation5 + $0x74] ss:$8 sps:$4 sm:$0xff]   ;;  %577 = vmatpush1.bf16.msra.mxu1 %v1605_v17  ;;  %v1608_v21 = vld [vmem:[#allocation7 + $0x10] ss:$8 sps:$4 sm:$0xff]   ;;  %v1577_v23 = vld [vmem:[#allocation5 + $0x84] ss:$8 sps:$4 sm:$0xff]  }
  0x75   :  { %373 = vmatprep.mubr.bf16.mxu0 %v1374_v15  ;;  %578 = vmatprep.subr.bf16.mxu1 %v1606_v18  ;;  %v1579_v24 = vld [vmem:[#allocation5 + $0x80] ss:$8 sps:$4 sm:$0xff]   ;;  %v1612_v26 = vld [vmem:[#allocation7 + $0x34] ss:$8 sps:$4 sm:$0xff]   ;;  %v1582_v28 = vld [vmem:[#allocation5 + $0x90] ss:$8 sps:$4 sm:$0xff]  }
  0x76   :  { %v1611_v25 = vld [vmem:[#allocation7 + $0x20] ss:$8 sps:$4 sm:$0xff]   ;;  %v1580_v27 = vld [vmem:[#allocation5 + $0x94] ss:$8 sps:$4 sm:$0xff]   ;;  %v1614_v29 = vld [vmem:[#allocation7 + $0x30] ss:$8 sps:$4 sm:$0xff]  }
  0x77   :  { %346 = vmatpush1.bf16.msra.mxu0 %v1561_v5  ;;  %v1615_v30 = vld [vmem:[#allocation7 + $0x44] ss:$8 sps:$4 sm:$0xff]   ;;  %v1585_v32 = vld [vmem:[#allocation5 + $0xa0] ss:$8 sps:$4 sm:$0xff]   ;;  %v1618_v34 = vld [vmem:[#allocation7 + $0x54] ss:$8 sps:$4 sm:$0xff]  }
  0x78   :  { %347 = vmatprep.subr.bf16.mxu0 %v1562_v6  ;;  %579 = vmatpush1.bf16.msra.mxu1 %v1608_v21  ;;  %v1583_v31 = vld [vmem:[#allocation5 + $0xa4] ss:$8 sps:$4 sm:$0xff]   ;;  %v1617_v33 = vld [vmem:[#allocation7 + $0x40] ss:$8 sps:$4 sm:$0xff]   ;;  %v1586_v35 = vld [vmem:[#allocation5 + $0xb4] ss:$8 sps:$4 sm:$0xff]  }
  0x79   :  { %580 = vmatprep.subr.bf16.mxu1 %v1609_v22  ;;  %v1588_v36 = vld [vmem:[#allocation5 + $0xb0] ss:$8 sps:$4 sm:$0xff]   ;;  %v1621_v38 = vld [vmem:[#allocation7 + $0x64] ss:$8 sps:$4 sm:$0xff]   ;;  %v1623_v40 = vld [vmem:[#allocation7 + $0x60] ss:$8 sps:$4 sm:$0xff]  }
  0x7a   :  { %v1620_v37 = vld [vmem:[#allocation7 + $0x50] ss:$8 sps:$4 sm:$0xff]   ;;  %v1589_v39 = vld [vmem:[#allocation5 + $0xc4] ss:$8 sps:$4 sm:$0xff]   ;;  %v1591_v41 = vld [vmem:[#allocation5 + $0xc0] ss:$8 sps:$4 sm:$0xff]  }
  0x7b   :  { %348 = vmatpush1.bf16.msra.mxu0 %v1564_v7  ;;  %v1624_v42 = vld [vmem:[#allocation7 + $0x74] ss:$8 sps:$4 sm:$0xff]   ;;  %v1626_v44 = vld [vmem:[#allocation7 + $0x70] ss:$8 sps:$4 sm:$0xff]   ;;  %v1627_v46 = vld [vmem:[#allocation7 + $0x84] ss:$8 sps:$4 sm:$0xff]  }
  0x7c   :  { %349 = vmatprep.subr.bf16.mxu0 %v1565_v8  ;;  %581 = vmatpush1.bf16.msra.mxu1 %v1611_v25  ;;  %v1592_v43 = vld [vmem:[#allocation5 + $0xd4] ss:$8 sps:$4 sm:$0xff]   ;;  %v1594_v45 = vld [vmem:[#allocation5 + $0xd0] ss:$8 sps:$4 sm:$0xff]   ;;  %v1595_v47 = vld [vmem:[#allocation5 + $0xe4] ss:$8 sps:$4 sm:$0xff]  }
  0x7d   :  { %582 = vmatprep.subr.bf16.mxu1 %v1612_v26  ;;  %v1629_v48 = vld [vmem:[#allocation7 + $0x80] ss:$8 sps:$4 sm:$0xff]   ;;  %v1630_v50 = vld [vmem:[#allocation7 + $0x94] ss:$8 sps:$4 sm:$0xff]   ;;  %v1632_v52 = vld [vmem:[#allocation7 + $0x90] ss:$8 sps:$4 sm:$0xff]  }
  0x7e   :  { %v1597_v49 = vld [vmem:[#allocation5 + $0xe0] ss:$8 sps:$4 sm:$0xff]   ;;  %v1598_v51 = vld [vmem:[#allocation5 + $0xf4] ss:$8 sps:$4 sm:$0xff]   ;;  %v1600_v53 = vld [vmem:[#allocation5 + $0xf0] ss:$8 sps:$4 sm:$0xff]  }
  0x7f   :  { %350 = vmatpush1.bf16.msra.mxu0 %v1567_v9  ;;  %v1633_v54 = vld [vmem:[#allocation7 + $0xa4] ss:$8 sps:$4 sm:$0xff]   ;;  %v1635_v55 = vld [vmem:[#allocation7 + $0xa0] ss:$8 sps:$4 sm:$0xff]   ;;  %v1636_v56 = vld [vmem:[#allocation7 + $0xb4] ss:$8 sps:$4 sm:$0xff]  }
  0x80   :  { %351 = vmatprep.subr.bf16.mxu0 %v1568_v10  ;;  %583 = vmatpush1.bf16.msra.mxu1 %v1614_v29  ;;  %v1638_v58 = vld [vmem:[#allocation7 + $0xb0] ss:$8 sps:$4 sm:$0xff]   ;;  %v1639_v59 = vld [vmem:[#allocation7 + $0xc4] ss:$8 sps:$4 sm:$0xff]   ;;  %v1641_v60 = vld [vmem:[#allocation7 + $0xc0] ss:$8 sps:$4 sm:$0xff]  }
  0x81   :  { %584 = vmatprep.subr.bf16.mxu1 %v1615_v30  ;;  %v1642_v61 = vld [vmem:[#allocation7 + $0xd4] ss:$8 sps:$4 sm:$0xff]   ;;  %v1644_v62 = vld [vmem:[#allocation7 + $0xd0] ss:$8 sps:$4 sm:$0xff]   ;;  %v1645_v63 = vld [vmem:[#allocation7 + $0xe4] ss:$8 sps:$4 sm:$0xff]  }
  0x82   :  { %v1647_v0 = vld [vmem:[#allocation7 + $0xe0] ss:$8 sps:$4 sm:$0xff]   ;;  %v1648_v1 = vld [vmem:[#allocation7 + $0xf4] ss:$8 sps:$4 sm:$0xff]   ;;  %v1650_v2 = vld [vmem:[#allocation7 + $0xf0] ss:$8 sps:$4 sm:$0xff]  }
  0x83   :  { %352 = vmatpush1.bf16.msra.mxu0 %v1570_v11  ;;  %v1651_v3 = vld [vmem:[#allocation8] ss:$8 sps:$4 sm:$0xff]   ;;  %v1653_v4 = vld [vmem:[#allocation8 + $0x4] ss:$8 sps:$4 sm:$0xff]   ;;  %v1656_v5 = vld [vmem:[#allocation8 + $0x14] ss:$8 sps:$4 sm:$0xff]  }
  0x84   :  { %353 = vmatprep.subr.bf16.mxu0 %v1571_v12  ;;  %585 = vmatpush1.bf16.msra.mxu1 %v1617_v33  ;;  %v1654_v6 = vld [vmem:[#allocation8 + $0x10] ss:$8 sps:$4 sm:$0xff]   ;;  %v1659_v7 = vld [vmem:[#allocation8 + $0x24] ss:$8 sps:$4 sm:$0xff]   ;;  %v1657_v8 = vld [vmem:[#allocation8 + $0x20] ss:$8 sps:$4 sm:$0xff]  }
  0x85   :  { %586 = vmatprep.subr.bf16.mxu1 %v1618_v34  ;;  %v1662_v9 = vld [vmem:[#allocation8 + $0x34] ss:$8 sps:$4 sm:$0xff]   ;;  %v1660_v10 = vld [vmem:[#allocation8 + $0x30] ss:$8 sps:$4 sm:$0xff]   ;;  %v1665_v11 = vld [vmem:[#allocation8 + $0x44] ss:$8 sps:$4 sm:$0xff]  }
  0x86   :  { %v1663_v12 = vld [vmem:[#allocation8 + $0x40] ss:$8 sps:$4 sm:$0xff]   ;;  %v1666_v14 = vld [vmem:[#allocation8 + $0x50] ss:$8 sps:$4 sm:$0xff]   ;;  %v1671_v15 = vld [vmem:[#allocation8 + $0x64] ss:$8 sps:$4 sm:$0xff]  }
  0x87   :  { %354 = vmatpush1.bf16.msra.mxu0 %v1573_v13  ;;  %v1668_v13 = vld [vmem:[#allocation8 + $0x54] ss:$8 sps:$4 sm:$0xff]   ;;  %v1669_v16 = vld [vmem:[#allocation8 + $0x60] ss:$8 sps:$4 sm:$0xff]   ;;  %v1672_v18 = vld [vmem:[#allocation8 + $0x70] ss:$8 sps:$4 sm:$0xff]  }
  0x88   :  { %355 = vmatprep.subr.bf16.mxu0 %v1574_v19  ;;  %587 = vmatpush1.bf16.msra.mxu1 %v1620_v37  ;;  %v1674_v17 = vld [vmem:[#allocation8 + $0x74] ss:$8 sps:$4 sm:$0xff]   ;;  %v1677_v19 = vld [vmem:[#allocation8 + $0x84] ss:$8 sps:$4 sm:$0xff]   ;;  %v1678_v22 = vld [vmem:[#allocation8 + $0x90] ss:$8 sps:$4 sm:$0xff]  }
  0x89   :  { %588 = vmatprep.subr.bf16.mxu1 %v1621_v38  ;;  %v1680_v21 = vld [vmem:[#allocation8 + $0x94] ss:$8 sps:$4 sm:$0xff]   ;;  %v1684_v26 = vld [vmem:[#allocation8 + $0xb0] ss:$8 sps:$4 sm:$0xff]   ;;  %s1361_s17 = sshll.u32 %s1937_s16, 4  ;;  %s1362_s17 = int_to_ptr.vmem [resolvable:$true] %s1361_s17 }
  0x8a   :  { %v1686_v25 = vld [vmem:[#allocation8 + $0xb4] ss:$8 sps:$4 sm:$0xff]   ;;  %v1690_v30 = vld [vmem:[#allocation8 + $0xd0] ss:$8 sps:$4 sm:$0xff]   ;;  %s1895_s18 = scalar_lea.vmem %s1362_s17, 128  ;;  %p1900_p7 = scmp.lt.s32.totalorder %s1362_s17, %s1362_s17 }
  0x8b   :  { %356 = vmatpush1.bf16.msra.mxu0 %v1576_v20  ;;  %v1675_v20 = vld [vmem:[#allocation8 + $0x80] ss:$8 sps:$4 sm:$0xff]   ;;  %v1692_v29 = vld [vmem:[#allocation8 + $0xd4] ss:$8 sps:$4 sm:$0xff]   ;;  %v162_v34 = vld [vmem:[%s2159_s2] sm:$0x3]  ;;  %p1896_p6 = scmp.ne.s32.totalorder %s1362_s17, %s1895_s18  ;;  %p1901_p8 = scmp.lt.s32.totalorder %s1895_s18, %s1895_s18 }
  0x8c   :  { %357 = vmatprep.subr.bf16.mxu0 %v1577_v23  ;;  %589 = vmatpush1.bf16.msra.mxu1 %v1623_v40  ;;  %v1683_v23 = vld [vmem:[#allocation8 + $0xa4] ss:$8 sps:$4 sm:$0xff]  }
  0x8d   :  { %590 = vmatprep.subr.bf16.mxu1 %v1624_v42  ;;  %p1902_p9 = por %p1901_p8, %p1900_p7 }
  0x8f   :  { %358 = vmatpush1.bf16.msra.mxu0 %v1579_v24  ;;  %v1681_v24 = vld [vmem:[#allocation8 + $0xa0] ss:$8 sps:$4 sm:$0xff]   ;;  %p1903_p10 = pnand %p1902_p9, %p1896_p6 }
  0x90   :  { %359 = vmatprep.subr.bf16.mxu0 %v1580_v27  ;;  %591 = vmatpush1.bf16.msra.mxu1 %v1626_v44  ;;  %v1689_v27 = vld [vmem:[#allocation8 + $0xc4] ss:$8 sps:$4 sm:$0xff]  }
  0x91   :  { %592 = vmatprep.subr.bf16.mxu1 %v1627_v46  ;;  %v1695_v46 = vld [vmem:[#allocation8 + $0xe4] ss:$8 sps:$4 sm:$0xff]  }
  0x93   :  { %360 = vmatpush1.bf16.msra.mxu0 %v1582_v28  ;;  %v1687_v28 = vld [vmem:[#allocation8 + $0xc0] ss:$8 sps:$4 sm:$0xff]  }
  0x94   :  { %361 = vmatprep.subr.bf16.mxu0 %v1583_v31  ;;  %593 = vmatpush1.bf16.msra.mxu1 %v1629_v48  ;;  %v164_v31 = vlaneseq  ;;  %v1698_v48 = vld [vmem:[#allocation8 + $0xf4] ss:$8 sps:$4 sm:$0xff]  }
  0x95   :  { %594 = vmatprep.subr.bf16.mxu1 %v1630_v50  ;;  %v1699_v50 = vld [vmem:[#allocation10] ss:$8 sps:$4 sm:$0xff]  }
  0x97   :  { %362 = vmatpush1.bf16.msra.mxu0 %v1585_v32  ;;  %v165_v32 = vshrl.u32 %v164_v31, 7 }
  0x98   :  { %363 = vmatprep.subr.bf16.mxu0 %v1586_v35  ;;  %595 = vmatpush1.bf16.msra.mxu1 %v1632_v52  ;;  %v1704_v52 = vld [vmem:[#allocation10 + $0x14] ss:$8 sps:$4 sm:$0xff]  }
  0x99   :  { %596 = vmatprep.subr.bf16.mxu1 %v1633_v54  ;;  %v2103_v33 = vsub.s32 0, %v165_v32  ;;  %v2108_v35 = vsub.s32 1, %v165_v32  ;;  %v1707_v54 = vld [vmem:[#allocation10 + $0x24] ss:$8 sps:$4 sm:$0xff]  }
  0x9a   :  { %v1743_v32 = vld [vmem:[#allocation10 + $0xe4] ss:$8 sps:$4 sm:$0xff]  }
  0x9b   :  { %364 = vmatpush1.bf16.msra.mxu0 %v1588_v36  ;;  %v167_v36 = vrot.slane %v162_v34, %v2103_v33  ;;  %v171_v37 = vrot.slane %v162_v34, %v2108_v35  ;;  %v1741_v34 = vld [vmem:[#allocation10 + $0xe0] ss:$8 sps:$4 sm:$0xff]  }
  0x9c   :  { %365 = vmatprep.subr.bf16.mxu0 %v1589_v39  ;;  %597 = vmatpush1.bf16.msra.mxu1 %v1635_v55  ;;  %v1705_v55 = vld [vmem:[#allocation10 + $0x20] ss:$8 sps:$4 sm:$0xff]  }
  0x9d   :  { %598 = vmatprep.subr.bf16.mxu1 %v1636_v56  ;;  %v1710_v56 = vld [vmem:[#allocation10 + $0x34] ss:$8 sps:$4 sm:$0xff]  }
  0x9f   :  { %366 = vmatpush1.bf16.msra.mxu0 %v1591_v41 }
  0xa0   :  { %367 = vmatprep.subr.bf16.mxu0 %v1592_v43  ;;  %599 = vmatpush1.bf16.msra.mxu1 %v1638_v58  ;;  %v1713_v58 = vld [vmem:[#allocation10 + $0x44] ss:$8 sps:$4 sm:$0xff]  }
  0xa1   :  { %600 = vmatprep.subr.bf16.mxu1 %v1639_v59  ;;  %v1711_v59 = vld [vmem:[#allocation10 + $0x40] ss:$8 sps:$4 sm:$0xff]  }
  0xa3   :  { %368 = vmatpush1.bf16.msra.mxu0 %v1594_v45 }
  0xa4   :  { %369 = vmatprep.subr.bf16.mxu0 %v1595_v47  ;;  %601 = vmatpush1.bf16.msra.mxu1 %v1641_v60  ;;  %v1693_v47 = vld [vmem:[#allocation8 + $0xe0] ss:$8 sps:$4 sm:$0xff]   ;;  %v1716_v60 = vld [vmem:[#allocation10 + $0x54] ss:$8 sps:$4 sm:$0xff]  }
  0xa5   :  { %602 = vmatprep.subr.bf16.mxu1 %v1642_v61  ;;  %v1714_v61 = vld [vmem:[#allocation10 + $0x50] ss:$8 sps:$4 sm:$0xff]  }
  0xa7   :  { %370 = vmatpush1.bf16.msra.mxu0 %v1597_v49  ;;  %v1696_v49 = vld [vmem:[#allocation8 + $0xf0] ss:$8 sps:$4 sm:$0xff]  }
  0xa8   :  { %371 = vmatprep.subr.bf16.mxu0 %v1598_v51  ;;  %603 = vmatpush1.bf16.msra.mxu1 %v1644_v62  ;;  %v1701_v51 = vld [vmem:[#allocation10 + $0x4] ss:$8 sps:$4 sm:$0xff]  }
  0xa9   :  { %604 = vmatprep.subr.bf16.mxu1 %v1645_v63  ;;  %v1719_v62 = vld [vmem:[#allocation10 + $0x64] ss:$8 sps:$4 sm:$0xff]   ;;  %v1717_v63 = vld [vmem:[#allocation10 + $0x60] ss:$8 sps:$4 sm:$0xff]  }
  0xab   :  { %372 = vmatpush1.bf16.msra.mxu0 %v1600_v53  ;;  %v1702_v53 = vld [vmem:[#allocation10 + $0x10] ss:$8 sps:$4 sm:$0xff]  }
  0xac   :  { %605 = vmatpush1.bf16.msra.mxu1 %v1647_v0  ;;  %841 = vmatprep.subr.bf16.mxu0 %v1653_v4  ;;  %v1722_v0 = vld [vmem:[#allocation10 + $0x74] ss:$8 sps:$4 sm:$0xff]  }
  0xad   :  { %606 = vmatprep.subr.bf16.mxu1 %v1648_v1  ;;  %v1720_v1 = vld [vmem:[#allocation10 + $0x70] ss:$8 sps:$4 sm:$0xff]   ;;  %v1728_v4 = vld [vmem:[#allocation10 + $0x94] ss:$8 sps:$4 sm:$0xff]  }
  0xae   :  { %374 = vmatmul.mubr.bf16.vlgmr.msra.gmra.mrb[0].mxu0 %v1373_v57  ;;  %v1708_v57 = vld [vmem:[#allocation10 + $0x30] ss:$8 sps:$4 sm:$0xff]  }
  0xaf   :  { %842 = vmatpush1.bf16.msra.mxu0 %v1651_v3  ;;  %v1723_v3 = vld [vmem:[#allocation10 + $0x80] ss:$8 sps:$4 sm:$0xff]  }
  0xb0   :  { %607 = vmatpush1.bf16.msra.mxu1 %v1650_v2  ;;  %843 = vmatprep.subr.bf16.mxu0 %v1656_v5  ;;  %v1725_v2 = vld [vmem:[#allocation10 + $0x84] ss:$8 sps:$4 sm:$0xff]   ;;  %v1726_v5 = vld [vmem:[#allocation10 + $0x90] ss:$8 sps:$4 sm:$0xff]  }
  0xb1   :  { %1106 = vmatprep.subr.bf16.mxu1 %v1701_v51 }
  0xb3   :  { %844 = vmatpush1.bf16.msra.mxu0 %v1654_v6  ;;  %v1731_v6 = vld [vmem:[#allocation10 + $0xa4] ss:$8 sps:$4 sm:$0xff]  }
  0xb4   :  { %845 = vmatprep.subr.bf16.mxu0 %v1659_v7  ;;  %v1729_v7 = vld [vmem:[#allocation10 + $0xa0] ss:$8 sps:$4 sm:$0xff]  }
  0xb7   :  { %846 = vmatpush1.bf16.msra.mxu0 %v1657_v8  ;;  %v1734_v8 = vld [vmem:[#allocation10 + $0xb4] ss:$8 sps:$4 sm:$0xff]  }
  0xb8   :  { %847 = vmatprep.subr.bf16.mxu0 %v1662_v9  ;;  %v1732_v9 = vld [vmem:[#allocation10 + $0xb0] ss:$8 sps:$4 sm:$0xff]  }
  0xbb   :  { %848 = vmatpush1.bf16.msra.mxu0 %v1660_v10  ;;  %v1737_v10 = vld [vmem:[#allocation10 + $0xc4] ss:$8 sps:$4 sm:$0xff]  }
  0xbc   :  { %849 = vmatprep.subr.bf16.mxu0 %v1665_v11  ;;  %v1735_v11 = vld [vmem:[#allocation10 + $0xc0] ss:$8 sps:$4 sm:$0xff]  }
  0xbf   :  { %850 = vmatpush1.bf16.msra.mxu0 %v1663_v12  ;;  %v1740_v12 = vld [vmem:[#allocation10 + $0xd4] ss:$8 sps:$4 sm:$0xff]  }
  0xc0   :  { %851 = vmatprep.subr.bf16.mxu0 %v1668_v13  ;;  %v1738_v13 = vld [vmem:[#allocation10 + $0xd0] ss:$8 sps:$4 sm:$0xff]  }
  0xc3   :  { %852 = vmatpush1.bf16.msra.mxu0 %v1666_v14  ;;  %v617_v14 = vld [vmem:[%s2161_s4] sm:$0x3] }
  0xc4   :  { %853 = vmatprep.subr.bf16.mxu0 %v1671_v15  ;;  %v631_v15 = vld [vmem:[%s2162_s5] sm:$0x3] }
  0xc7   :  { %854 = vmatpush1.bf16.msra.mxu0 %v1669_v16  ;;  %v622_v16 = vrot.slane %v617_v14, %v2103_v33 }
  0xc8   :  { %855 = vmatprep.subr.bf16.mxu0 %v1674_v17  ;;  %v626_v17 = vrot.slane %v617_v14, %v2108_v35 }
  0xcb   :  { %856 = vmatpush1.bf16.msra.mxu0 %v1672_v18  ;;  %v636_v18 = vrot.slane %v631_v15, %v2103_v33 }
  0xcc   :  { %857 = vmatprep.subr.bf16.mxu0 %v1677_v19 }
  0xcf   :  { %858 = vmatpush1.bf16.msra.mxu0 %v1675_v20  ;;  %v640_v20 = vrot.slane %v631_v15, %v2108_v35 }
  0xd0   :  { %859 = vmatprep.subr.bf16.mxu0 %v1680_v21 }
  0xd3   :  { %860 = vmatpush1.bf16.msra.mxu0 %v1678_v22 }
  0xd4   :  { %861 = vmatprep.subr.bf16.mxu0 %v1683_v23 }
  0xd7   :  { %862 = vmatpush1.bf16.msra.mxu0 %v1681_v24 }
  0xd8   :  { %863 = vmatprep.subr.bf16.mxu0 %v1686_v25 }
  0xdb   :  { %864 = vmatpush1.bf16.msra.mxu0 %v1684_v26 }
  0xdc   :  { %865 = vmatprep.subr.bf16.mxu0 %v1689_v27 }
  0xdf   :  { %866 = vmatpush1.bf16.msra.mxu0 %v1687_v28 }
  0xe0   :  { %867 = vmatprep.subr.bf16.mxu0 %v1692_v29 }
  0xe3   :  { %868 = vmatpush1.bf16.msra.mxu0 %v1690_v30 }
  0xe4   :  { %869 = vmatprep.subr.bf16.mxu0 %v1695_v46  ;;  %v1755_v46 = vld [vmem:[#allocation11 + $0x60] sm:$0xff]  }
  0xe7   :  { %870 = vmatpush1.bf16.msra.mxu0 %v1693_v47  ;;  %v1756_v47 = vld [vmem:[#allocation11 + $0x20] sm:$0xff]  }
  0xe8   :  { %871 = vmatprep.subr.bf16.mxu0 %v1698_v48  ;;  %v1757_v48 = vld [vmem:[#allocation11 + $0x68] sm:$0xff]  }
  0xeb   :  { %872 = vmatpush1.bf16.msra.mxu0 %v1696_v49  ;;  %v882_v49 = vld [vmem:[%s2164_s7] sm:$0x3] }
  0xec   :  { %v887_v51 = vrot.slane %v882_v49, %v2103_v33 }
 0x181   :  { %v375_v38 = vpop.f32.mrb[0].mxu0 }
 0x182   :  { %v376_v39 = vadd.f32 %v375_v38, %v167_v36  ;;  %v377_v40 = vpop.f32.mrb[1].mxu0  ;;  %v1746_v36 = vld [vmem:[#allocation10 + $0xf4] ss:$8 sps:$4 sm:$0xff]   ;;  %v1747_v38 = vld [vmem:[#allocation11 + $0x40] sm:$0xff]  }
 0x183   :  { %v379_v41 = vpop.f32.mrb[2].mxu0  ;;  %v378_v42 = vadd.f32 %v377_v40, %v171_v37  ;;  %v1744_v37 = vld [vmem:[#allocation10 + $0xf0] ss:$8 sps:$4 sm:$0xff]   ;;  %v1749_v40 = vld [vmem:[#allocation11 + $0x48] sm:$0xff]   ;;  %1520 = vmatprep.subr.bf16.mxu0 %v1747_v38 }
 0x184   :  { %v380_v43 = vpop.f32.mrb[3].mxu0  ;;  %v382_v45 = vpack.c.bf16 %v376_v39, %v376_v39  ;;  %v1748_v39 = vld [vmem:[#allocation11] sm:$0xff]   ;;  %v1750_v41 = vld [vmem:[#allocation11 + $0x8] sm:$0xff]  }
 0x185   :  { %v383_v44 = vpack.c.bf16 %v378_v42, %v378_v42  ;;  %v1751_v42 = vld [vmem:[#allocation11 + $0x50] sm:$0xff]  }
 0x186   :  { %v1752_v43 = vld [vmem:[#allocation11 + $0x10] sm:$0xff]  }
 0x187   :  { %608 = vmatprep.mubr.bf16.mxu1 %v383_v44  ;;  %v1753_v44 = vld [vmem:[#allocation11 + $0x58] sm:$0xff]  }
 0x188   :  { %609 = vmatmul.mubr.bf16.vlgmr.msra.gmra.mrb[0].mxu1 %v382_v45  ;;  %v1754_v45 = vld [vmem:[#allocation11 + $0x18] sm:$0xff]  }
 0x189   :  { %1107 = vmatpush1.bf16.msra.mxu1 %v1699_v50  ;;  %v896_v50 = vld [vmem:[%s2165_s8] sm:$0x3] }
 0x18a   :  { %1108 = vmatprep.subr.bf16.mxu1 %v1704_v52  ;;  %v891_v52 = vrot.slane %v882_v49, %v2108_v35 }
 0x18d   :  { %1109 = vmatpush1.bf16.msra.mxu1 %v1702_v53  ;;  %v901_v53 = vrot.slane %v896_v50, %v2103_v33 }
 0x18e   :  { %1110 = vmatprep.subr.bf16.mxu1 %v1707_v54 }
 0x191   :  { %1111 = vmatpush1.bf16.msra.mxu1 %v1705_v55  ;;  %v905_v55 = vrot.slane %v896_v50, %v2108_v35 }
 0x192   :  { %1112 = vmatprep.subr.bf16.mxu1 %v1710_v56 }
 0x195   :  { %1113 = vmatpush1.bf16.msra.mxu1 %v1708_v57 }
 0x196   :  { %1114 = vmatprep.subr.bf16.mxu1 %v1713_v58 }
 0x199   :  { %1115 = vmatpush1.bf16.msra.mxu1 %v1711_v59 }
 0x19a   :  { %1116 = vmatprep.subr.bf16.mxu1 %v1716_v60 }
 0x19d   :  { %1117 = vmatpush1.bf16.msra.mxu1 %v1714_v61 }
 0x19e   :  { %1118 = vmatprep.subr.bf16.mxu1 %v1719_v62 }
 0x1a1   :  { %1119 = vmatpush1.bf16.msra.mxu1 %v1717_v63 }
 0x1a2   :  { %1120 = vmatprep.subr.bf16.mxu1 %v1722_v0 }
 0x1a5   :  { %1121 = vmatpush1.bf16.msra.mxu1 %v1720_v1 }
 0x1a6   :  { %1122 = vmatprep.subr.bf16.mxu1 %v1725_v2 }
 0x1a9   :  { %1123 = vmatpush1.bf16.msra.mxu1 %v1723_v3  ;;  %v1758_v3 = vld [vmem:[#allocation11 + $0x28] sm:$0xff]  }
 0x1aa   :  { %1124 = vmatprep.subr.bf16.mxu1 %v1728_v4  ;;  %v1759_v4 = vld [vmem:[#allocation11 + $0x70] sm:$0xff]  }
 0x1ad   :  { %1125 = vmatpush1.bf16.msra.mxu1 %v1726_v5  ;;  %v1760_v5 = vld [vmem:[#allocation11 + $0x30] sm:$0xff]  }
 0x1ae   :  { %1126 = vmatprep.subr.bf16.mxu1 %v1731_v6  ;;  %v1761_v6 = vld [vmem:[#allocation11 + $0x78] sm:$0xff]  }
 0x1b1   :  { %1127 = vmatpush1.bf16.msra.mxu1 %v1729_v7  ;;  %v1762_v7 = vld [vmem:[#allocation11 + $0x38] sm:$0xff]  }
 0x1b2   :  { %1128 = vmatprep.subr.bf16.mxu1 %v1734_v8  ;;  %v1147_v8 = vld [vmem:[%s2167_s10] sm:$0x3] }
 0x1b5   :  { %1129 = vmatpush1.bf16.msra.mxu1 %v1732_v9  ;;  %v1161_v9 = vld [vmem:[%s2168_s11] sm:$0x3] }
 0x1b6   :  { %1130 = vmatprep.subr.bf16.mxu1 %v1737_v10  ;;  %v1152_v10 = vrot.slane %v1147_v8, %v2103_v33  ;;  %v1170_v14 = vrot.slane %v1161_v9, %v2108_v35 }
 0x1b9   :  { %1131 = vmatpush1.bf16.msra.mxu1 %v1735_v11  ;;  %v1156_v11 = vrot.slane %v1147_v8, %v2108_v35 }
 0x1ba   :  { %1132 = vmatprep.subr.bf16.mxu1 %v1740_v12  ;;  %v1166_v12 = vrot.slane %v1161_v9, %v2103_v33  ;;  %v1503_v33 = vld [vmem:[%s2170_s13] ss:$0 sm:$0xff] }
 0x1bd   :  { %1133 = vmatpush1.bf16.msra.mxu1 %v1738_v13 }
 0x1be   :  { %1134 = vmatprep.subr.bf16.mxu1 %v1743_v32 }
 0x1c1   :  { %1135 = vmatpush1.bf16.msra.mxu1 %v1741_v34 }
 0x1c2   :  { %1136 = vmatprep.subr.bf16.mxu1 %v1746_v36 }
 0x1c5   :  { %1137 = vmatpush1.bf16.msra.mxu1 %v1744_v37 }
 0x25b   :  { %v610_v19 = vpop.f32.mrb[0].mxu1 }
 0x25c   :  { %v629_v21 = vmul.f32 %v622_v16, %v610_v19  ;;  %v612_v22 = vpop.f32.mrb[1].mxu1 }
 0x25d   :  { %v630_v23 = vmul.f32 %v626_v17, %v612_v22  ;;  %v614_v24 = vpop.f32.mrb[2].mxu1 }
 0x25e   :  { %v643_v25 = vadd.f32 %v636_v18, %v629_v21  ;;  %v615_v26 = vpop.f32.mrb[3].mxu1 }
 0x25f   :  { %v644_v27 = vadd.f32 %v640_v20, %v630_v23 }
 0x260   :  { %v645_v28 = vmax.f32 %v643_v25, 0.0 }
 0x261   :  { %v646_v29 = vmax.f32 %v644_v27, 0.0 }
 0x262   :  { %v647_v31 = vpack.c.bf16 %v645_v28, %v645_v28 }
 0x263   :  { %v648_v30 = vpack.c.bf16 %v646_v29, %v646_v29 }
 0x265   :  { %873 = vmatprep.mubr.bf16.mxu0 %v648_v30 }
 0x266   :  { %874 = vmatmul.mubr.bf16.vlgmr.msra.gmra.mrb[4].mxu0 %v647_v31 }
 0x267   :  { %1521 = vmatpush3.bf16.msra.mxu0 %v1748_v39 }
 0x268   :  { %1522 = vmatprep.subr.bf16.mxu0 %v1749_v40 }
 0x26b   :  { %1523 = vmatpush3.bf16.msra.mxu0 %v1750_v41 }
 0x26c   :  { %1524 = vmatprep.subr.bf16.mxu0 %v1751_v42 }
 0x26f   :  { %1525 = vmatpush3.bf16.msra.mxu0 %v1752_v43 }
 0x270   :  { %1526 = vmatprep.subr.bf16.mxu0 %v1753_v44 }
 0x273   :  { %1527 = vmatpush3.bf16.msra.mxu0 %v1754_v45 }
 0x274   :  { %1528 = vmatprep.subr.bf16.mxu0 %v1755_v46 }
 0x277   :  { %1529 = vmatpush3.bf16.msra.mxu0 %v1756_v47 }
 0x278   :  { %1530 = vmatprep.subr.bf16.mxu0 %v1757_v48 }
 0x27b   :  { %1531 = vmatpush3.bf16.msra.mxu0 %v1758_v3 }
 0x27c   :  { %1532 = vmatprep.subr.bf16.mxu0 %v1759_v4 }
 0x27f   :  { %1533 = vmatpush3.bf16.msra.mxu0 %v1760_v5 }
 0x280   :  { %1534 = vmatprep.subr.bf16.mxu0 %v1761_v6 }
 0x283   :  { %1535 = vmatpush3.bf16.msra.mxu0 %v1762_v7 }
 0x339   :  { %v875_v54 = vpop.f32.mrb[4].mxu0 }
 0x33a   :  { %v894_v56 = vmul.f32 %v887_v51, %v875_v54  ;;  %v877_v57 = vpop.f32.mrb[5].mxu0 }
 0x33b   :  { %v895_v58 = vmul.f32 %v891_v52, %v877_v57  ;;  %v879_v59 = vpop.f32.mrb[6].mxu0 }
 0x33c   :  { %v908_v60 = vadd.f32 %v901_v53, %v894_v56  ;;  %v880_v61 = vpop.f32.mrb[7].mxu0 }
 0x33d   :  { %v909_v62 = vadd.f32 %v905_v55, %v895_v58 }
 0x33e   :  { %v910_v63 = vmax.f32 %v908_v60, 0.0 }
 0x33f   :  { %v911_v0 = vmax.f32 %v909_v62, 0.0 }
 0x340   :  { %v912_v2 = vpack.c.bf16 %v910_v63, %v910_v63 }
 0x341   :  { %v913_v1 = vpack.c.bf16 %v911_v0, %v911_v0 }
 0x343   :  { %1138 = vmatprep.mubr.bf16.mxu1 %v913_v1 }
 0x344   :  { %1139 = vmatmul.mubr.bf16.vlgmr.msra.gmra.mrb[4].mxu1 %v912_v2 }
 0x417   :  { %v1140_v13 = vpop.f32.mrb[4].mxu1 }
 0x418   :  { %v1159_v15 = vmul.f32 %v1152_v10, %v1140_v13  ;;  %v1142_v16 = vpop.f32.mrb[5].mxu1 }
 0x419   :  { %v1160_v17 = vmul.f32 %v1156_v11, %v1142_v16  ;;  %v1144_v18 = vpop.f32.mrb[6].mxu1 }
 0x41a   :  { %v1173_v19 = vadd.f32 %v1166_v12, %v1159_v15  ;;  %v1145_v20 = vpop.f32.mrb[7].mxu1 }
 0x41b   :  { %v1174_v21 = vadd.f32 %v1170_v14, %v1160_v17 }
 0x41c   :  { %v1175_v22 = vmax.f32 %v1173_v19, 0.0 }
 0x41d   :  { %v1176_v23 = vmax.f32 %v1174_v21, 0.0 }
 0x41e   :  { %v1177_v25 = vpack.c.bf16 %v1175_v22, %v1175_v22 }
 0x41f   :  { %v1178_v24 = vpack.c.bf16 %v1176_v23, %v1176_v23 }
 0x421   :  { %1346 = vmatprep.mubr.bf16.mxu0 %v1178_v24 }
 0x422   :  { %1347 = vmatmul.mubr.bf16.vlgmr.msra.gmra.mrb[8].mxu0 %v1177_v25 }
 0x4f5   :  { %v1536_v26 = vpop.f32.mrb[8].mxu0 }
 0x4f6   :  { %v1537_v27 = vpop.f32.mrb[9].mxu0 }
 0x4f7   :  { %v1538_v35 = vadd.f32 %v1537_v27, %v1536_v26  ;;  %v1539_v28 = vpop.f32.mrb[10].mxu0 }
 0x4f8   :  { %v1540_v29 = vpop.f32.mrb[11].mxu0 }
 0x4f9   :  { %v1349_v30 = vadd.f32 %v1538_v35, %v1503_v33 }
 0x4fb   :  { %1354 = vst [vmem:[#allocation13] sm:$0xff] %v1349_v30 }
 0x4fc   :  { %1906 = shalt.err (!%p1903_p10)
}
 0x4fd   :  { %s1907_s13 = scalar_lea.hbm %s2171_s14, 128 }
 0x4fe   :  { %p1908_p11 = scmp.ne.s32.totalorder %s2171_s14, %s1907_s13  ;;  %p1911_p12 = scmp.lt.u32.totalorder %s1907_s13, %s2171_s14 }
 0x500   :  { %p1913_p13 = pnand %p1911_p12, %p1908_p11 }
 0x502   :  { %1916 = shalt.err (!%p1913_p13)
}
 0x503   :  { %1364 = dma.vmem_to_hbm [thread:$0]  %s1362_s17, 128, %s2171_s14, [#allocation4]  }
 0x504   :  { %1925 = dma.done.wait [#allocation4], 128  }
 0x505   :  { %1926 = vsyncadd [#allocation4], 4294967168 }
 0x506   :  { %1368 = vsyncpa [#allocation3], 1 }
 0x507   :  { %1369 = vsyncpa [#allocation6], 1 }
 0x508   :  { %1370 = vsyncpa [#allocation9], 1 }
 0x509   :  { %1371 = vsyncpa [#allocation12], 1 }
 0x50a   :  { %1372 = vsyncpa [#allocation4], 1 }

</bundles_post_ra>
